<compile_context>
chip_gen: v7x
topology: tpu7x:2x2x1
jax: 0.10.0
libtpu: 0.0.40
codegen_flags: <defaults>
</compile_context>

<pallas_src>
import jax
import jax.numpy as jnp
from jax import lax
from jax.experimental import pallas as pl
from jax.experimental.pallas import tpu as pltpu

NEG_SLOPE = 0.01          # F.leaky_relu default negative_slope
H1, H2 = 256, 512         # hidden sizes from the module
LANE = 128


def _round_up(v, m):
    return ((v + m - 1) // m) * m


def _leaky_relu(x):
    return jnp.where(x > 0, x, NEG_SLOPE * x)


# ---------------------------------------------------------------------------
# Wrapper-side (plain XLA) hash precompute.  Deterministic, so the pure-JAX
# reference is bit-reproducible.  These run once per call on tiny arrays.
# ---------------------------------------------------------------------------
def _mix32(x):
    """splitmix32-style finalizer on uint32 (wrapping).  Wrapper-side only."""
    x = x + jnp.uint32(0x9E3779B9)
    x = x ^ (x >> 16)
    x = x * jnp.uint32(0x85EBCA6B)
    x = x ^ (x >> 13)
    x = x * jnp.uint32(0xC2B2AE35)
    x = x ^ (x >> 16)
    return x


def _row_hash(n_rows, seed):
    """One full-entropy 32-bit word per example row.  Shape (N, 1) uint32."""
    s = (int(seed) * 0x9E3779B9) & 0xFFFFFFFF
    r = jnp.arange(n_rows, dtype=jnp.uint32)
    return _mix32(r ^ jnp.uint32(s))[:, None]


def _col_words(n_cols, seed, stream):
    """Two full-entropy 32-bit words (xor word A, add word B) per column for one
    Flipout sign stream.  Shape (2, cols) uint32."""
    a_const = (int(seed) ^ ((stream * 0x632BE59B) & 0xFFFFFFFF)) & 0xFFFFFFFF
    b_const = (0x7F4A7C15 + int(seed) + stream * 0x2545F491) & 0xFFFFFFFF
    c = jnp.arange(n_cols, dtype=jnp.uint32)
    a = _mix32(c ^ jnp.uint32(a_const))
    b = _mix32(c + jnp.uint32(b_const))
    return jnp.stack([a, b], axis=0)


# ---------------------------------------------------------------------------
# Kernel
# ---------------------------------------------------------------------------
def _mlp_kernel(rh_ref, x_ref,
                c1i_ref, c1o_ref, c2i_ref, c2o_ref,
                w1m_ref, b1m_ref, w1d_ref, b1d_ref,
                w2m_ref, b2m_ref, w2d_ref, b2d_ref,
                w3_ref, b3_ref,
                out_ref):
    f32 = jnp.float32
    u32 = jnp.uint32
    bf16 = jnp.bfloat16
    msb = jnp.uint32(0x80000000)

    rh = rh_ref[...]                              # (tm, 1) uint32, per-row hash

    def sign_mask(cw_ref):
        # 3 int ops / element: xor + add (carry mixing) + mask MSB.
        cw = cw_ref[...]                          # (2, cols) uint32
        return ((rh ^ cw[0:1, :]) + cw[1:2, :]) & msb

    def flip(v_f32, mask):
        # multiply by the Flipout +-1 sign == XOR the hash MSB into the f32 sign bit
        return pltpu.bitcast(pltpu.bitcast(v_f32, u32) ^ mask, f32)

    x16 = x_ref[...]                              # (tm, in1) bf16
    x_f32 = x16.astype(f32)

    # ---- LinearFlipout 1: in1 -> h1 ----
    xp16 = flip(x_f32, sign_mask(c1i_ref)).astype(bf16)     # x * sign_in  (exact)
    h_mean = jnp.dot(x16, w1m_ref[...], preferred_element_type=f32)
    h_pert = jnp.dot(xp16, w1d_ref[...], preferred_element_type=f32)
    t1 = flip(h_pert + b1d_ref[...], sign_mask(c1o_ref))    # (.. + db) * sign_out
    h = _leaky_relu(h_mean + b1m_ref[...] + t1)

    # ---- LinearFlipout 2: h1 -> h2 ----
    h16 = h.astype(bf16)
    hp16 = flip(h, sign_mask(c2i_ref)).astype(bf16)
    g_mean = jnp.dot(h16, w2m_ref[...], preferred_element_type=f32)
    g_pert = jnp.dot(hp16, w2d_ref[...], preferred_element_type=f32)
    t2 = flip(g_pert + b2d_ref[...], sign_mask(c2o_ref))
    g = _leaky_relu(g_mean + b2m_ref[...] + t2)

    # ---- plain Linear: h2 -> dim_x, zero-padded to lane-dense 128 outputs ----
    g16 = g.astype(bf16)
    o = jnp.dot(g16, w3_ref[...], preferred_element_type=f32) + b3_ref[...]
    out_ref[...] = o.astype(bf16)                 # bf16 writeback (halves HBM traffic)


# ---------------------------------------------------------------------------
# Wrapper
# ---------------------------------------------------------------------------
def process_model_seq_mlp(x, params, seed=0, tm_max=512):
    """x: (n, en, k, dim) float32. Returns (n, en, dim_x) float32."""
    n, en, k, dim = x.shape
    N = n * en
    in1 = k * dim

    (w1m, b1m, w1d, b1d, w2m, b2m, w2d, b2d, w3, b3) = params
    h1 = w1m.shape[1]
    h2 = w2m.shape[1]
    dim_x = w3.shape[1]
    out_pad = _round_up(max(dim_x, LANE), LANE)     # lane-dense output width

    # bf16 matmul operands; biases stay f32.
    x16 = x.reshape(N, in1).astype(jnp.bfloat16)
    w1m16 = w1m.astype(jnp.bfloat16)
    w1d16 = w1d.astype(jnp.bfloat16)
    w2m16 = w2m.astype(jnp.bfloat16)
    w2d16 = w2d.astype(jnp.bfloat16)
    w3p = jnp.zeros((h2, out_pad), jnp.float32).at[:, :dim_x].set(w3).astype(jnp.bfloat16)
    b3p = jnp.zeros((1, out_pad), jnp.float32).at[:, :dim_x].set(b3)

    # Flipout sign hashes (see header): 4 B/row streamed + tiny resident col words.
    rh = _row_hash(N, seed)
    c1i = _col_words(in1, seed, 0)
    c1o = _col_words(h1, seed, 1)
    c2i = _col_words(h1, seed, 2)
    c2o = _col_words(h2, seed, 3)

    # Row tile: as large as practical, but always >=2 grid steps so the "parallel"
    # axis can shard across v7x's two TensorCores.
    tm = min(tm_max, _round_up(N, 16))
    if N > 16:
        tm = min(tm, _round_up(pl.cdiv(N, 2), 16))
    num_tiles = pl.cdiv(N, tm)

    flops = 2 * N * (2 * in1 * h1 + 2 * h1 * h2 + h2 * out_pad)
    bytes_accessed = (N * in1 * 2                         # x (bf16)
                      + N * 4                             # row hash (u32)
                      + N * out_pad * 2                   # output (bf16)
                      + 2 * (in1 * h1 + h1 * h2) * 2      # flipout mean+delta weights
                      + h2 * out_pad * 2                  # w3 (bf16)
                      + (2 * h1 + 2 * h2 + out_pad) * 4   # biases (f32)
                      + 2 * (in1 + 2 * h1 + h2) * 4)      # column hash words

    res = lambda i: (0, 0)    # weights / biases / col words: VMEM-resident

    grid_spec = pltpu.PrefetchScalarGridSpec(
        num_scalar_prefetch=0,
        grid=(num_tiles,),
        in_specs=[
            pl.BlockSpec((tm, 1), lambda i: (i, 0)),       # row hash
            pl.BlockSpec((tm, in1), lambda i: (i, 0)),     # x rows
            pl.BlockSpec((2, in1), res),                   # sign words: layer1 in
            pl.BlockSpec((2, h1), res),                    # sign words: layer1 out
            pl.BlockSpec((2, h1), res),                    # sign words: layer2 in
            pl.BlockSpec((2, h2), res),                    # sign words: layer2 out
            pl.BlockSpec((in1, h1), res),                  # w1m
            pl.BlockSpec((1, h1), res),                    # b1m
            pl.BlockSpec((in1, h1), res),                  # w1d
            pl.BlockSpec((1, h1), res),                    # b1d
            pl.BlockSpec((h1, h2), res),                   # w2m
            pl.BlockSpec((1, h2), res),                    # b2m
            pl.BlockSpec((h1, h2), res),                   # w2d
            pl.BlockSpec((1, h2), res),                    # b2d
            pl.BlockSpec((h2, out_pad), res),              # w3 (padded)
            pl.BlockSpec((1, out_pad), res),               # b3 (padded)
        ],
        out_specs=pl.BlockSpec((tm, out_pad), lambda i: (i, 0)),
    )

    out = pl.pallas_call(
        _mlp_kernel,
        out_shape=jax.ShapeDtypeStruct((N, out_pad), jnp.bfloat16),
        grid_spec=grid_spec,
        compiler_params=pltpu.CompilerParams(
            dimension_semantics=("parallel",),
            vmem_limit_bytes=32 * 1024 * 1024),
        cost_estimate=pl.CostEstimate(
            flops=flops, transcendentals=0, bytes_accessed=bytes_accessed),
    )(rh, x16, c1i, c1o, c2i, c2o,
      w1m16, b1m, w1d16, b1d, w2m16, b2m, w2d16, b2d, w3p, b3p)

    # NOTE: a fused downstream consumer should read the padded (N, 128) bf16 buffer
    # directly and skip this slice pass (it is kept here only for module-API fidelity).
    return out[:, :dim_x].astype(jnp.float32).reshape(n, en, dim_x)


# ---------------------------------------------------------------------------
# Synthetic parameters + pure-JAX reference (mirrors the kernel's casts & signs)
# ---------------------------------------------------------------------------
def init_params(key, dim_x, win_size):
    """Weight means ~N(0,0.05); dW = softplus(-3)*eps (bayesian-torch default rho
    init).  Weights stored (in, out); biases (1, out)."""
    in1 = dim_x * win_size
    sigma = jnp.log1p(jnp.exp(jnp.float32(-3.0)))
    ks = jax.random.split(key, 10)
    w1m = 0.05 * jax.random.normal(ks[0], (in1, H1), jnp.float32)
    b1m = 0.05 * jax.random.normal(ks[1], (1, H1), jnp.float32)
    w1d = sigma * jax.random.normal(ks[2], (in1, H1), jnp.float32)
    b1d = sigma * jax.random.normal(ks[3], (1, H1), jnp.float32)
    w2m = 0.05 * jax.random.normal(ks[4], (H1, H2), jnp.float32)
    b2m = 0.05 * jax.random.normal(ks[5], (1, H2), jnp.float32)
    w2d = sigma * jax.random.normal(ks[6], (H1, H2), jnp.float32)
    b2d = sigma * jax.random.normal(ks[7], (1, H2), jnp.float32)
    w3 = 0.05 * jax.random.normal(ks[8], (H2, dim_x), jnp.float32)
    b3 = 0.05 * jax.random.normal(ks[9], (1, dim_x), jnp.float32)
    return (w1m, b1m, w1d, b1d, w2m, b2m, w2d, b2d, w3, b3)


def reference_forward(x, params, seed):
    n, en, k, dim = x.shape
    N = n * en
    in1 = k * dim
    (w1m, b1m, w1d, b1d, w2m, b2m, w2d, b2d, w3, b3) = params
    h1 = w1m.shape[1]
    h2 = w2m.shape[1]
    dim_x = w3.shape[1]
    bf, f32, u32 = jnp.bfloat16, jnp.float32, jnp.uint32
    msb = jnp.uint32(0x80000000)

    rh = _row_hash(N, seed)

    def mask(cw):
        return ((rh ^ cw[0:1, :]) + cw[1:2, :]) & msb

    def flip(v, m):
        return lax.bitcast_convert_type(lax.bitcast_convert_type(v, u32) ^ m, f32)

    def dot(a, b):
        return jnp.dot(a, b, preferred_element_type=f32)

    m1i = mask(_col_words(in1, seed, 0))
    m1o = mask(_col_words(h1, seed, 1))
    m2i = mask(_col_words(h1, seed, 2))
    m2o = mask(_col_words(h2, seed, 3))

    x16 = x.reshape(N, in1).astype(bf)
    xf = x16.astype(f32)
    xp16 = flip(xf, m1i).astype(bf)
    t1 = flip(dot(xp16, w1d.astype(bf)) + b1d, m1o)
    h = _leaky_relu(dot(x16, w1m.astype(bf)) + b1m + t1)

    h16 = h.astype(bf)
    hp16 = flip(h, m2i).astype(bf)
    t2 = flip(dot(hp16, w2d.astype(bf)) + b2d, m2o)
    g = _leaky_relu(dot(h16, w2m.astype(bf)) + b2m + t2)

    g16 = g.astype(bf)
    o = (dot(g16, w3.astype(bf)) + b3).astype(bf).astype(f32)
    return o.reshape(n, en, dim_x)


if __name__ == "__main__":
    # Small shapes consistent with the module:
    #   batch n=2, num_ensemble=32, win_size=8, dim_x=16  -> in_features = 128
    #   (dim_model / num_heads are unused in forward); N = 64 -> 2 grid steps.
    n, en, win_size, dim_x = 2, 32, 8, 16
    seed = 1234

    key = jax.random.PRNGKey(0)
    k_in, k_par = jax.random.split(key)
    x = jax.random.normal(k_in, (n, en, win_size, dim_x), jnp.float32)
    params = init_params(k_par, dim_x, win_size)

    out = process_model_seq_mlp(x, params, seed=seed)
    out = jax.block_until_ready(out)

    ref = reference_forward(x, params, seed)
    assert out.shape == (n, en, dim_x)
    assert bool(jnp.all(jnp.isfinite(out)))
    max_err = float(jnp.max(jnp.abs(out - ref)))
    assert jnp.allclose(out, ref, atol=2e-2, rtol=2e-2), max_err

    print("KERNEL_OK")
</pallas_src>

<mosaic_0001>
module attributes {stable_mosaic.version = 11 : i64} {
  func.func @_mlp_kernel(%arg0: i32, %arg1: memref<32x1xi32, #tpu.memory_space<vmem>>, %arg2: memref<32x128xbf16, #tpu.memory_space<vmem>>, %arg3: memref<2x128xi32, #tpu.memory_space<vmem>>, %arg4: memref<2x256xi32, #tpu.memory_space<vmem>>, %arg5: memref<2x256xi32, #tpu.memory_space<vmem>>, %arg6: memref<2x512xi32, #tpu.memory_space<vmem>>, %arg7: memref<128x256xbf16, #tpu.memory_space<vmem>>, %arg8: memref<1x256xf32, #tpu.memory_space<vmem>>, %arg9: memref<128x256xbf16, #tpu.memory_space<vmem>>, %arg10: memref<1x256xf32, #tpu.memory_space<vmem>>, %arg11: memref<256x512xbf16, #tpu.memory_space<vmem>>, %arg12: memref<1x512xf32, #tpu.memory_space<vmem>>, %arg13: memref<256x512xbf16, #tpu.memory_space<vmem>>, %arg14: memref<1x512xf32, #tpu.memory_space<vmem>>, %arg15: memref<512x128xbf16, #tpu.memory_space<vmem>>, %arg16: memref<1x128xf32, #tpu.memory_space<vmem>>, %arg17: memref<32x128xbf16, #tpu.memory_space<vmem>>) attributes {dimension_semantics = [#tpu.dimension_semantics<parallel>], iteration_bounds = array<i64: 2>, scalar_prefetch = 0 : i64, scratch_operands = 0 : i64, tpu.core_type = #tpu.core_type<tc>, window_params = [{transform_indices = @transform_0, window_bounds = array<i64: 32, 1>}, {transform_indices = @transform_1, window_bounds = array<i64: 32, 128>}, {pipeline_mode = #tpu.pipeline_mode<synchronous>, transform_indices = @transform_2, window_bounds = array<i64: 2, 128>}, {pipeline_mode = #tpu.pipeline_mode<synchronous>, transform_indices = @transform_3, window_bounds = array<i64: 2, 256>}, {pipeline_mode = #tpu.pipeline_mode<synchronous>, transform_indices = @transform_4, window_bounds = array<i64: 2, 256>}, {pipeline_mode = #tpu.pipeline_mode<synchronous>, transform_indices = @transform_5, window_bounds = array<i64: 2, 512>}, {pipeline_mode = #tpu.pipeline_mode<synchronous>, transform_indices = @transform_6, window_bounds = array<i64: 128, 256>}, {pipeline_mode = #tpu.pipeline_mode<synchronous>, transform_indices = @transform_7, window_bounds = array<i64: 1, 256>}, {pipeline_mode = #tpu.pipeline_mode<synchronous>, transform_indices = @transform_8, window_bounds = array<i64: 128, 256>}, {pipeline_mode = #tpu.pipeline_mode<synchronous>, transform_indices = @transform_9, window_bounds = array<i64: 1, 256>}, {pipeline_mode = #tpu.pipeline_mode<synchronous>, transform_indices = @transform_10, window_bounds = array<i64: 256, 512>}, {pipeline_mode = #tpu.pipeline_mode<synchronous>, transform_indices = @transform_11, window_bounds = array<i64: 1, 512>}, {pipeline_mode = #tpu.pipeline_mode<synchronous>, transform_indices = @transform_12, window_bounds = array<i64: 256, 512>}, {pipeline_mode = #tpu.pipeline_mode<synchronous>, transform_indices = @transform_13, window_bounds = array<i64: 1, 512>}, {pipeline_mode = #tpu.pipeline_mode<synchronous>, transform_indices = @transform_14, window_bounds = array<i64: 512, 128>}, {pipeline_mode = #tpu.pipeline_mode<synchronous>, transform_indices = @transform_15, window_bounds = array<i64: 1, 128>}, {transform_indices = @transform_16, window_bounds = array<i64: 32, 128>}]} {
    %c0 = arith.constant 0 : index
    %c0_0 = arith.constant 0 : index
    %0 = vector.load %arg1[%c0, %c0_0] : memref<32x1xi32, #tpu.memory_space<vmem>>, vector<32x1xi32>
    %c0_1 = arith.constant 0 : index
    %c0_2 = arith.constant 0 : index
    %1 = vector.load %arg2[%c0_1, %c0_2] : memref<32x128xbf16, #tpu.memory_space<vmem>>, vector<32x128xbf16>
    %2 = arith.extf %1 : vector<32x128xbf16> to vector<32x128xf32>
    %c0_3 = arith.constant 0 : index
    %c0_4 = arith.constant 0 : index
    %3 = vector.load %arg3[%c0_3, %c0_4] : memref<2x128xi32, #tpu.memory_space<vmem>>, vector<2x128xi32>
    %4 = vector.extract_strided_slice %3 {offsets = [0, 0], sizes = [1, 128], strides = [1, 1]} : vector<2x128xi32> to vector<1x128xi32>
    %5 = vector.broadcast %0 : vector<32x1xi32> to vector<32x128xi32>
    %6 = vector.broadcast %4 : vector<1x128xi32> to vector<32x128xi32>
    %7 = arith.xori %5, %6 : vector<32x128xi32>
    %8 = vector.extract_strided_slice %3 {offsets = [1, 0], sizes = [1, 128], strides = [1, 1]} : vector<2x128xi32> to vector<1x128xi32>
    %9 = vector.broadcast %8 : vector<1x128xi32> to vector<32x128xi32>
    %10 = arith.addi %7, %9 : vector<32x128xi32>
    %c-2147483648_i32 = arith.constant -2147483648 : i32
    %11 = vector.broadcast %c-2147483648_i32 : i32 to vector<32x128xi32>
    %12 = arith.andi %10, %11 : vector<32x128xi32>
    %13 = tpu.bitcast %2 : vector<32x128xf32> -> vector<32x128xi32>
    %14 = arith.xori %13, %12 : vector<32x128xi32>
    %15 = tpu.bitcast %14 : vector<32x128xi32> -> vector<32x128xf32>
    %16 = arith.truncf %15 : vector<32x128xf32> to vector<32x128xbf16>
    %c0_5 = arith.constant 0 : index
    %c0_6 = arith.constant 0 : index
    %17 = vector.load %arg7[%c0_5, %c0_6] : memref<128x256xbf16, #tpu.memory_space<vmem>>, vector<128x256xbf16>
    %cst = arith.constant dense<0.000000e+00> : vector<32x256xf32>
    %18 = tpu.matmul %1, %17, %cst {dimension_numbers = #tpu.dot_dimension_numbers<[1], [0], [0], [1], [0, 0, 1, 1], [], []>} : vector<32x128xbf16>, vector<128x256xbf16>, vector<32x256xf32> -> vector<32x256xf32>
    %c0_7 = arith.constant 0 : index
    %c0_8 = arith.constant 0 : index
    %19 = vector.load %arg9[%c0_7, %c0_8] : memref<128x256xbf16, #tpu.memory_space<vmem>>, vector<128x256xbf16>
    %cst_9 = arith.constant dense<0.000000e+00> : vector<32x256xf32>
    %20 = tpu.matmul %16, %19, %cst_9 {dimension_numbers = #tpu.dot_dimension_numbers<[1], [0], [0], [1], [0, 0, 1, 1], [], []>} : vector<32x128xbf16>, vector<128x256xbf16>, vector<32x256xf32> -> vector<32x256xf32>
    %c0_10 = arith.constant 0 : index
    %c0_11 = arith.constant 0 : index
    %21 = vector.load %arg10[%c0_10, %c0_11] : memref<1x256xf32, #tpu.memory_space<vmem>>, vector<1x256xf32>
    %22 = vector.broadcast %21 : vector<1x256xf32> to vector<32x256xf32>
    %23 = arith.addf %20, %22 : vector<32x256xf32>
    %c0_12 = arith.constant 0 : index
    %c0_13 = arith.constant 0 : index
    %24 = vector.load %arg4[%c0_12, %c0_13] : memref<2x256xi32, #tpu.memory_space<vmem>>, vector<2x256xi32>
    %25 = vector.extract_strided_slice %24 {offsets = [0, 0], sizes = [1, 256], strides = [1, 1]} : vector<2x256xi32> to vector<1x256xi32>
    %26 = vector.broadcast %0 : vector<32x1xi32> to vector<32x256xi32>
    %27 = vector.broadcast %25 : vector<1x256xi32> to vector<32x256xi32>
    %28 = arith.xori %26, %27 : vector<32x256xi32>
    %29 = vector.extract_strided_slice %24 {offsets = [1, 0], sizes = [1, 256], strides = [1, 1]} : vector<2x256xi32> to vector<1x256xi32>
    %30 = vector.broadcast %29 : vector<1x256xi32> to vector<32x256xi32>
    %31 = arith.addi %28, %30 : vector<32x256xi32>
    %c-2147483648_i32_14 = arith.constant -2147483648 : i32
    %32 = vector.broadcast %c-2147483648_i32_14 : i32 to vector<32x256xi32>
    %33 = arith.andi %31, %32 : vector<32x256xi32>
    %34 = tpu.bitcast %23 : vector<32x256xf32> -> vector<32x256xi32>
    %35 = arith.xori %34, %33 : vector<32x256xi32>
    %36 = tpu.bitcast %35 : vector<32x256xi32> -> vector<32x256xf32>
    %c0_15 = arith.constant 0 : index
    %c0_16 = arith.constant 0 : index
    %37 = vector.load %arg8[%c0_15, %c0_16] : memref<1x256xf32, #tpu.memory_space<vmem>>, vector<1x256xf32>
    %38 = vector.broadcast %37 : vector<1x256xf32> to vector<32x256xf32>
    %39 = arith.addf %18, %38 : vector<32x256xf32>
    %40 = arith.addf %39, %36 : vector<32x256xf32>
    %cst_17 = arith.constant 0.000000e+00 : f32
    %41 = vector.broadcast %cst_17 : f32 to vector<32x256xf32>
    %42 = arith.cmpf ogt, %40, %41 : vector<32x256xf32>
    %cst_18 = arith.constant 0.00999999977 : f32
    %43 = vector.broadcast %cst_18 : f32 to vector<32x256xf32>
    %44 = arith.mulf %43, %40 : vector<32x256xf32>
    %45 = arith.select %42, %40, %44 : vector<32x256xi1>, vector<32x256xf32>
    %46 = arith.truncf %45 : vector<32x256xf32> to vector<32x256xbf16>
    %c0_19 = arith.constant 0 : index
    %c0_20 = arith.constant 0 : index
    %47 = vector.load %arg5[%c0_19, %c0_20] : memref<2x256xi32, #tpu.memory_space<vmem>>, vector<2x256xi32>
    %48 = vector.extract_strided_slice %47 {offsets = [0, 0], sizes = [1, 256], strides = [1, 1]} : vector<2x256xi32> to vector<1x256xi32>
    %49 = vector.broadcast %0 : vector<32x1xi32> to vector<32x256xi32>
    %50 = vector.broadcast %48 : vector<1x256xi32> to vector<32x256xi32>
    %51 = arith.xori %49, %50 : vector<32x256xi32>
    %52 = vector.extract_strided_slice %47 {offsets = [1, 0], sizes = [1, 256], strides = [1, 1]} : vector<2x256xi32> to vector<1x256xi32>
    %53 = vector.broadcast %52 : vector<1x256xi32> to vector<32x256xi32>
    %54 = arith.addi %51, %53 : vector<32x256xi32>
    %c-2147483648_i32_21 = arith.constant -2147483648 : i32
    %55 = vector.broadcast %c-2147483648_i32_21 : i32 to vector<32x256xi32>
    %56 = arith.andi %54, %55 : vector<32x256xi32>
    %57 = tpu.bitcast %45 : vector<32x256xf32> -> vector<32x256xi32>
    %58 = arith.xori %57, %56 : vector<32x256xi32>
    %59 = tpu.bitcast %58 : vector<32x256xi32> -> vector<32x256xf32>
    %60 = arith.truncf %59 : vector<32x256xf32> to vector<32x256xbf16>
    %c0_22 = arith.constant 0 : index
    %c0_23 = arith.constant 0 : index
    %61 = vector.load %arg11[%c0_22, %c0_23] : memref<256x512xbf16, #tpu.memory_space<vmem>>, vector<256x512xbf16>
    %cst_24 = arith.constant dense<0.000000e+00> : vector<32x512xf32>
    %62 = tpu.matmul %46, %61, %cst_24 {dimension_numbers = #tpu.dot_dimension_numbers<[1], [0], [0], [1], [0, 0, 1, 1], [], []>} : vector<32x256xbf16>, vector<256x512xbf16>, vector<32x512xf32> -> vector<32x512xf32>
    %c0_25 = arith.constant 0 : index
    %c0_26 = arith.constant 0 : index
    %63 = vector.load %arg13[%c0_25, %c0_26] : memref<256x512xbf16, #tpu.memory_space<vmem>>, vector<256x512xbf16>
    %cst_27 = arith.constant dense<0.000000e+00> : vector<32x512xf32>
    %64 = tpu.matmul %60, %63, %cst_27 {dimension_numbers = #tpu.dot_dimension_numbers<[1], [0], [0], [1], [0, 0, 1, 1], [], []>} : vector<32x256xbf16>, vector<256x512xbf16>, vector<32x512xf32> -> vector<32x512xf32>
    %c0_28 = arith.constant 0 : index
    %c0_29 = arith.constant 0 : index
    %65 = vector.load %arg14[%c0_28, %c0_29] : memref<1x512xf32, #tpu.memory_space<vmem>>, vector<1x512xf32>
    %66 = vector.broadcast %65 : vector<1x512xf32> to vector<32x512xf32>
    %67 = arith.addf %64, %66 : vector<32x512xf32>
    %c0_30 = arith.constant 0 : index
    %c0_31 = arith.constant 0 : index
    %68 = vector.load %arg6[%c0_30, %c0_31] : memref<2x512xi32, #tpu.memory_space<vmem>>, vector<2x512xi32>
    %69 = vector.extract_strided_slice %68 {offsets = [0, 0], sizes = [1, 512], strides = [1, 1]} : vector<2x512xi32> to vector<1x512xi32>
    %70 = vector.broadcast %0 : vector<32x1xi32> to vector<32x512xi32>
    %71 = vector.broadcast %69 : vector<1x512xi32> to vector<32x512xi32>
    %72 = arith.xori %70, %71 : vector<32x512xi32>
    %73 = vector.extract_strided_slice %68 {offsets = [1, 0], sizes = [1, 512], strides = [1, 1]} : vector<2x512xi32> to vector<1x512xi32>
    %74 = vector.broadcast %73 : vector<1x512xi32> to vector<32x512xi32>
    %75 = arith.addi %72, %74 : vector<32x512xi32>
    %c-2147483648_i32_32 = arith.constant -2147483648 : i32
    %76 = vector.broadcast %c-2147483648_i32_32 : i32 to vector<32x512xi32>
    %77 = arith.andi %75, %76 : vector<32x512xi32>
    %78 = tpu.bitcast %67 : vector<32x512xf32> -> vector<32x512xi32>
    %79 = arith.xori %78, %77 : vector<32x512xi32>
    %80 = tpu.bitcast %79 : vector<32x512xi32> -> vector<32x512xf32>
    %c0_33 = arith.constant 0 : index
    %c0_34 = arith.constant 0 : index
    %81 = vector.load %arg12[%c0_33, %c0_34] : memref<1x512xf32, #tpu.memory_space<vmem>>, vector<1x512xf32>
    %82 = vector.broadcast %81 : vector<1x512xf32> to vector<32x512xf32>
    %83 = arith.addf %62, %82 : vector<32x512xf32>
    %84 = arith.addf %83, %80 : vector<32x512xf32>
    %cst_35 = arith.constant 0.000000e+00 : f32
    %85 = vector.broadcast %cst_35 : f32 to vector<32x512xf32>
    %86 = arith.cmpf ogt, %84, %85 : vector<32x512xf32>
    %cst_36 = arith.constant 0.00999999977 : f32
    %87 = vector.broadcast %cst_36 : f32 to vector<32x512xf32>
    %88 = arith.mulf %87, %84 : vector<32x512xf32>
    %89 = arith.select %86, %84, %88 : vector<32x512xi1>, vector<32x512xf32>
    %90 = arith.truncf %89 : vector<32x512xf32> to vector<32x512xbf16>
    %c0_37 = arith.constant 0 : index
    %c0_38 = arith.constant 0 : index
    %91 = vector.load %arg15[%c0_37, %c0_38] : memref<512x128xbf16, #tpu.memory_space<vmem>>, vector<512x128xbf16>
    %cst_39 = arith.constant dense<0.000000e+00> : vector<32x128xf32>
    %92 = tpu.matmul %90, %91, %cst_39 {dimension_numbers = #tpu.dot_dimension_numbers<[1], [0], [0], [1], [0, 0, 1, 1], [], []>} : vector<32x512xbf16>, vector<512x128xbf16>, vector<32x128xf32> -> vector<32x128xf32>
    %c0_40 = arith.constant 0 : index
    %c0_41 = arith.constant 0 : index
    %93 = vector.load %arg16[%c0_40, %c0_41] : memref<1x128xf32, #tpu.memory_space<vmem>>, vector<1x128xf32>
    %94 = vector.broadcast %93 : vector<1x128xf32> to vector<32x128xf32>
    %95 = arith.addf %92, %94 : vector<32x128xf32>
    %96 = arith.truncf %95 : vector<32x128xf32> to vector<32x128xbf16>
    %c0_42 = arith.constant 0 : index
    %c0_43 = arith.constant 0 : index
    %97 = vector.load %arg17[%c0_42, %c0_43] : memref<32x128xbf16, #tpu.memory_space<vmem>>, vector<32x128xbf16>
    tpu.vector_store %arg17[%c0_42, %c0_43], %96 {strides = array<i32>} : memref<32x128xbf16, #tpu.memory_space<vmem>>, vector<32x128xbf16>,
    return
  }
  func.func @transform_0(%arg0: i32) -> (i32, i32) {
    %c0_i32 = arith.constant 0 : i32
    %c0_i32_0 = arith.constant 0 : i32
    return %arg0, %c0_i32 : i32, i32
  }
  func.func @transform_1(%arg0: i32) -> (i32, i32) {
    %c0_i32 = arith.constant 0 : i32
    %c0_i32_0 = arith.constant 0 : i32
    return %arg0, %c0_i32 : i32, i32
  }
  func.func @transform_2(%arg0: i32) -> (i32, i32) {
    %c0_i32 = arith.constant 0 : i32
    %c0_i32_0 = arith.constant 0 : i32
    %c0_i32_1 = arith.constant 0 : i32
    return %c0_i32, %c0_i32_0 : i32, i32
  }
  func.func @transform_3(%arg0: i32) -> (i32, i32) {
    %c0_i32 = arith.constant 0 : i32
    %c0_i32_0 = arith.constant 0 : i32
    %c0_i32_1 = arith.constant 0 : i32
    return %c0_i32, %c0_i32_0 : i32, i32
  }
  func.func @transform_4(%arg0: i32) -> (i32, i32) {
    %c0_i32 = arith.constant 0 : i32
    %c0_i32_0 = arith.constant 0 : i32
    %c0_i32_1 = arith.constant 0 : i32
    return %c0_i32, %c0_i32_0 : i32, i32
  }
  func.func @transform_5(%arg0: i32) -> (i32, i32) {
    %c0_i32 = arith.constant 0 : i32
    %c0_i32_0 = arith.constant 0 : i32
    %c0_i32_1 = arith.constant 0 : i32
    return %c0_i32, %c0_i32_0 : i32, i32
  }
  func.func @transform_6(%arg0: i32) -> (i32, i32) {
    %c0_i32 = arith.constant 0 : i32
    %c0_i32_0 = arith.constant 0 : i32
    %c0_i32_1 = arith.constant 0 : i32
    return %c0_i32, %c0_i32_0 : i32, i32
  }
  func.func @transform_7(%arg0: i32) -> (i32, i32) {
    %c0_i32 = arith.constant 0 : i32
    %c0_i32_0 = arith.constant 0 : i32
    %c0_i32_1 = arith.constant 0 : i32
    return %c0_i32, %c0_i32_0 : i32, i32
  }
  func.func @transform_8(%arg0: i32) -> (i32, i32) {
    %c0_i32 = arith.constant 0 : i32
    %c0_i32_0 = arith.constant 0 : i32
    %c0_i32_1 = arith.constant 0 : i32
    return %c0_i32, %c0_i32_0 : i32, i32
  }
  func.func @transform_9(%arg0: i32) -> (i32, i32) {
    %c0_i32 = arith.constant 0 : i32
    %c0_i32_0 = arith.constant 0 : i32
    %c0_i32_1 = arith.constant 0 : i32
    return %c0_i32, %c0_i32_0 : i32, i32
  }
  func.func @transform_10(%arg0: i32) -> (i32, i32) {
    %c0_i32 = arith.constant 0 : i32
    %c0_i32_0 = arith.constant 0 : i32
    %c0_i32_1 = arith.constant 0 : i32
    return %c0_i32, %c0_i32_0 : i32, i32
  }
  func.func @transform_11(%arg0: i32) -> (i32, i32) {
    %c0_i32 = arith.constant 0 : i32
    %c0_i32_0 = arith.constant 0 : i32
    %c0_i32_1 = arith.constant 0 : i32
    return %c0_i32, %c0_i32_0 : i32, i32
  }
  func.func @transform_12(%arg0: i32) -> (i32, i32) {
    %c0_i32 = arith.constant 0 : i32
    %c0_i32_0 = arith.constant 0 : i32
    %c0_i32_1 = arith.constant 0 : i32
    return %c0_i32, %c0_i32_0 : i32, i32
  }
  func.func @transform_13(%arg0: i32) -> (i32, i32) {
    %c0_i32 = arith.constant 0 : i32
    %c0_i32_0 = arith.constant 0 : i32
    %c0_i32_1 = arith.constant 0 : i32
    return %c0_i32, %c0_i32_0 : i32, i32
  }
  func.func @transform_14(%arg0: i32) -> (i32, i32) {
    %c0_i32 = arith.constant 0 : i32
    %c0_i32_0 = arith.constant 0 : i32
    %c0_i32_1 = arith.constant 0 : i32
    return %c0_i32, %c0_i32_0 : i32, i32
  }
  func.func @transform_15(%arg0: i32) -> (i32, i32) {
    %c0_i32 = arith.constant 0 : i32
    %c0_i32_0 = arith.constant 0 : i32
    %c0_i32_1 = arith.constant 0 : i32
    return %c0_i32, %c0_i32_0 : i32, i32
  }
  func.func @transform_16(%arg0: i32) -> (i32, i32) {
    %c0_i32 = arith.constant 0 : i32
    %c0_i32_0 = arith.constant 0 : i32
    return %arg0, %c0_i32 : i32, i32
  }
}

</mosaic_0001>

<bundles_post_ra>
// kernel: tpu_custom_call.1
= control target key start
LH: loop header
LB: loop body
LE: loop exit
PB: predicated region body
PF: predicated region fallthrough
CT: control target
= control target key end

     0   :  { %s4617_s0 = inlined_call_operand.vmem [shape: u32[64,1], index: 0, kind: input, shape index: {}]   ;;  %s4618_s1 = inlined_call_operand.vmem [shape: bf16[64,128], index: 1, kind: input, shape index: {}]   ;;  %s4619_s2 = inlined_call_operand.vmem [shape: u32[2,128], index: 2, kind: input, shape index: {}]   ;;  %s4620_s3 = inlined_call_operand.vmem [shape: u32[2,256], index: 3, kind: input, shape index: {}]   ;;  %s4621_s4 = inlined_call_operand.vmem [shape: u32[2,256], index: 4, kind: input, shape index: {}]   ;;  %s4622_s5 = inlined_call_operand.vmem [shape: u32[2,512], index: 5, kind: input, shape index: {}]   ;;  %s4623_s6 = inlined_call_operand.hbm [shape: bf16[128,256], index: 6, kind: input, shape index: {}]   ;;  %s4624_s7 = inlined_call_operand.vmem [shape: f32[1,256], index: 7, kind: input, shape index: {}]   ;;  %s4625_s8 = inlined_call_operand.hbm [shape: bf16[128,256], index: 8, kind: input, shape index: {}]   ;;  %s4626_s9 = inlined_call_operand.vmem [shape: f32[1,256], index: 9, kind: input, shape index: {}]   ;;  %s4627_s10 = inlined_call_operand.hbm [shape: bf16[256,512], index: 10, kind: input, shape index: {}]   ;;  %s4628_s11 = inlined_call_operand.vmem [shape: f32[1,512], index: 11, kind: input, shape index: {}]   ;;  %s4629_s12 = inlined_call_operand.hbm [shape: bf16[256,512], index: 12, kind: input, shape index: {}]   ;;  %s4630_s13 = inlined_call_operand.vmem [shape: f32[1,512], index: 13, kind: input, shape index: {}]   ;;  %s4631_s14 = inlined_call_operand.hbm [shape: bf16[512,128], index: 14, kind: input, shape index: {}]   ;;  %s4632_s15 = inlined_call_operand.vmem [shape: f32[1,128], index: 15, kind: input, shape index: {}]   ;;  %s4633_s16 = inlined_call_operand.hbm [shape: bf16[64,128], index: 16, kind: output, shape index: {}]  }
   0x1   :  { %4650 = sst [smem:[#allocation24_spill]] %s4617_s0 }
   0x2   :  { %4651 = sst [smem:[#allocation25_spill]] %s4628_s11 }
   0x3   :  { %4652 = sst [smem:[#allocation26_spill]] %s4630_s13 }
   0x4   :  { %4653 = sst [smem:[#allocation27_spill]] %s4632_s15 }
   0x5   :  { %4654 = sst [smem:[#allocation28_spill]] %s4633_s16 }
   0x6   :  { %21 = vsyncpa [#allocation3], 0 }
   0x7   :  { %22 = vsyncpa [#allocation6], 0 }
   0x8   :  { %23 = vsyncpa [#allocation9], 0 }
   0x9   :  { %24 = vsyncpa [#allocation4], 0 }
   0xa   :  { %26 = vsyncpa [#allocation4 + $0x1], 0  ;;  %s3978_s21 = smov 0   ;;  %s3980_s22 = smov 0  }
   0xb   :  { %s3982_s23 = smov 0   ;;  %s3984_s24 = smov 0  }
   0xc LB: > { %4655 = sst [smem:[#allocation16_spill]] %s3864_s21  ;;  %s3999_s25 = sadd.s32 4294967295, %s3876_s24   ;;  %s3876_s24 = sphi %s3984_s24, %s4689_s24   ;;  %s3872_s23 = sphi %s3982_s23, %s4692_s23   ;;  %s3868_s22 = sphi %s3980_s22, %s4691_s22   ;;  %s3864_s21 = sphi %s3978_s21, %s4690_s21  }
   0xd   : > { %4656 = sst [smem:[#allocation17_spill]] %s3868_s22  ;;  %s2990_s26 = sadd.s32 4294967294, %s3876_s24  }
   0xe   : > { %4657 = sst [smem:[#allocation18_spill]] %s3872_s23  ;;  %s4003_s27 = sadd.s32 1, %s3876_s24  }
   0xf   : > { %4658 = sst [smem:[#allocation19_spill]] %s3876_s24  ;;  %s385_s28 = sadd.s32 1, %s3872_s23 }
  0x10   : > { %4659 = sst [smem:[#allocation20_spill]] %s4003_s27  ;;  %s382_s29 = ssub.s32 %s3876_s24, %s4003_s27 }
  0x11   : > { %p395_p0 = scmp.ne.s32.totalorder %s3872_s23, %s3868_s22  ;;  %p383_p1 = scmp.eq.s32.totalorder %s382_s29, 0 }
  0x12   : > { %p396_p2 = scmp.eq.s32.totalorder %s3999_s25, 1  ;;  %p401_p3 = scmp.ne.s32.totalorder %s3868_s22, %s3864_s21 }
  0x13   : > { %p402_p4 = scmp.eq.s32.totalorder %s2990_s26, 1  ;;  %p2991_p7 = scmp.ge.s32.totalorder %s3876_s24, 1 }
  0x14   : > { %s4014_s30 = scalar_select %p383_p1, %s3872_s23, %s385_s28  }
  0x15   : > { %p4016_p5 = por %p396_p2, %p395_p0  ;;  %p4020_p6 = por %p402_p4, %p401_p3 }
  0x16   : > { %4660 = sst [smem:[#allocation21_spill]] %s4014_s30  ;;  %p409_p8 = scmp.lt.s32.totalorder %s3876_s24, 3 }
  0x17   : > { %s4661_s0 = scalar_select %p4016_p5, 1, 0 }
  0x18   : > { %s4663_s17 = scalar_select %p4020_p6, 1, 0 }
  0x19   : > { %4662 = sst [smem:[#allocation22_spill]] %s4661_s0  ;;  %p4641_p9 = scmp.eq.s32.totalorder %s3999_s25, 0 }
  0x1a   : > { %4664 = sst [smem:[#allocation23_spill]] %s4663_s17  ;;  %p4027_p10 = pnand %p2991_p7, %p409_p8 }
  0x1b   : > { %s3878_s19 = smov [#allocation5]   ;;  %s3879_s28 = smov [#allocation8]  }
  0x1c   : > { %s4665_s18 = scalar_select %p4027_p10, 1, 0 }
  0x1d   : > { %p3307_p11 = pneg %p4027_p10  ;;  %s449_s20 = sshll.u32 %s3878_s19, 4  ;;  %s450_s20 = int_to_ptr.vmem [resolvable:$true] %s449_s20 }
  0x1e   : > { %s481_s29 = sshll.u32 %s3879_s28, 4  ;;  %s3662_s27 = scalar_lea.hbm %s4625_s8, 2048  ;;  %s482_s29 = int_to_ptr.vmem [resolvable:$true] %s481_s29 }
  0x1f   : > { %p4035_p12 = pnand %p4641_p9, %p3307_p11  ;;  %p3663_p13 = scmp.ne.s32.totalorder %s4625_s8, %s3662_s27 }
  0x20   : > { %p3669_p3 = scmp.lt.u32.totalorder %s3662_s27, %s4625_s8 }
  0x21   : > { %p4047_p0 = pneg %p4035_p12 }
  0x23   : > { %p3665_p1 = pnand %p4047_p0, %p3663_p13 }
  0x25   : > { %p3666_p2 = pneg %p3665_p1 }
  0x27   : > { %p3671_p4 = pnand %p3669_p3, %p3666_p2 }
  0x29   : > { %3674 = shalt.err (!%p3671_p4)
}
  0x2a   : > { %s3675_s23 = scalar_lea.vmem %s450_s20, 2048  ;;  %p3683_p9 = scmp.lt.s32.totalorder %s450_s20, %s450_s20 }
  0x2b   : > { %p3676_p7 = scmp.ne.s32.totalorder %s450_s20, %s3675_s23  ;;  %p3684_p6 = scmp.lt.s32.totalorder %s3675_s23, %s3675_s23 }
  0x2d   : > { %p3678_p8 = pnand %p3676_p7, %p4047_p0  ;;  %p3685_p5 = por %p3684_p6, %p3683_p9 }
  0x2f   : > { %p3679_p11 = pneg %p3678_p8 }
  0x31   : > { %p3686_p10 = pnand %p3685_p5, %p3679_p11 }
  0x33   : > { %3689 = shalt.err (!%p3686_p10)
}
  0x34   : > { %s3880_s21 = smov 128   ;;  %s3881_s30 = smov 8  }
  0x35   : > { %3313 = dma.hbm_to_vmem [thread:$0]  (!%p4035_p12), %s4625_s8, 2048, %s450_s20, [#allocation6], %s3880_s21, %s3880_s21, %s3881_s30  }
  0x36   : > { %s3882_s27 = smov [#allocation2]   ;;  %s3690_s0 = scalar_lea.hbm %s4629_s12, 8192 }
  0x37   : > { %s433_s17 = sshll.u32 %s3882_s27, 4  ;;  %p3691_p5 = scmp.ne.s32.totalorder %s4629_s12, %s3690_s0  ;;  %s434_s17 = int_to_ptr.vmem [resolvable:$true] %s433_s17 }
  0x38   : > { %p3697_p10 = scmp.lt.u32.totalorder %s3690_s0, %s4629_s12 }
  0x39   : > { %p3693_p6 = pnand %p3691_p5, %p4047_p0 }
  0x3b   : > { %p3694_p9 = pneg %p3693_p6 }
  0x3d   : > { %p3699_p13 = pnand %p3697_p10, %p3694_p9 }
  0x3f   : > { %3702 = shalt.err (!%p3699_p13)
}
  0x40   : > { %s3703_s20 = scalar_lea.vmem %s482_s29, 8192  ;;  %p3711_p4 = scmp.lt.s32.totalorder %s482_s29, %s482_s29 }
  0x41   : > { %p3704_p1 = scmp.ne.s32.totalorder %s482_s29, %s3703_s20  ;;  %p3712_p7 = scmp.lt.s32.totalorder %s3703_s20, %s3703_s20 }
  0x43   : > { %p3706_p2 = pnand %p3704_p1, %p4047_p0  ;;  %p3713_p8 = por %p3712_p7, %p3711_p4 }
  0x45   : > { %p3707_p3 = pneg %p3706_p2 }
  0x47   : > { %p3714_p11 = pnand %p3713_p8, %p3707_p3 }
  0x49   : > { %3717 = shalt.err (!%p3714_p11)
}
  0x4a   : > { %s4648_s15 = smov 256   ;;  %s4649_s22 = smov 16  }
  0x4b   : > { %3319 = dma.hbm_to_vmem [thread:$0]  (!%p4035_p12), %s4629_s12, 8192, %s482_s29, [#allocation9], %s4648_s15, %s4648_s15, %s4649_s22  }
  0x4c   : > { %s3718_s24 = scalar_lea.hbm %s4623_s6, 2048 }
  0x4d   : > { %p3719_p5 = scmp.ne.s32.totalorder %s4623_s6, %s3718_s24  ;;  %p3725_p10 = scmp.lt.u32.totalorder %s3718_s24, %s4623_s6 }
  0x4f   : > { %p3721_p6 = pnand %p3719_p5, %p4047_p0 }
  0x51   : > { %p3722_p9 = pneg %p3721_p6 }
  0x53   : > { %p3727_p13 = pnand %p3725_p10, %p3722_p9 }
  0x55   : > { %3730 = shalt.err (!%p3727_p13)
}
  0x56   : > { %s3731_s11 = scalar_lea.vmem %s434_s17, 2048  ;;  %p3739_p4 = scmp.lt.s32.totalorder %s434_s17, %s434_s17 }
  0x57   : > { %p3732_p1 = scmp.ne.s32.totalorder %s434_s17, %s3731_s11  ;;  %p3740_p7 = scmp.lt.s32.totalorder %s3731_s11, %s3731_s11 }
  0x59   : > { %p3734_p2 = pnand %p3732_p1, %p4047_p0  ;;  %p3741_p8 = por %p3740_p7, %p3739_p4 }
  0x5b   : > { %p3735_p3 = pneg %p3734_p2 }
  0x5d   : > { %p3742_p11 = pnand %p3741_p8, %p3735_p3 }
  0x5f   : > { %3745 = shalt.err (!%p3742_p11)
}
  0x60   : > { %3310 = dma.hbm_to_vmem [thread:$0]  (!%p4035_p12), %s4623_s6, 2048, %s434_s17, [#allocation3], %s3880_s21, %s3880_s21, %s3881_s30  }
  0x61   : > { %s3885_s0 = smov [#allocation7]   ;;  %s3886_s24 = smov [#allocation10]  }
  0x62   : > { %s465_s16 = sshll.u32 %s3885_s0, 4  ;;  %s497_s27 = sshll.u32 %s3886_s24, 4  ;;  %s466_s16 = int_to_ptr.vmem [resolvable:$true] %s465_s16  ;;  %s498_s27 = int_to_ptr.vmem [resolvable:$true] %s497_s27 }
  0x63   : > { %s3746_s20 = scalar_lea.hbm %s4627_s10, 8192 }
  0x64   : > { %p3747_p5 = scmp.ne.s32.totalorder %s4627_s10, %s3746_s20  ;;  %p3753_p10 = scmp.lt.u32.totalorder %s3746_s20, %s4627_s10 }
  0x66   : > { %p3749_p6 = pnand %p3747_p5, %p4047_p0 }
  0x68   : > { %p3750_p9 = pneg %p3749_p6 }
  0x6a   : > { %p3755_p13 = pnand %p3753_p10, %p3750_p9 }
  0x6c   : > { %3758 = shalt.err (!%p3755_p13)
}
  0x6d   : > { %s3759_s21 = scalar_lea.vmem %s466_s16, 8192  ;;  %p3767_p4 = scmp.lt.s32.totalorder %s466_s16, %s466_s16 }
  0x6e   : > { %p3760_p1 = scmp.ne.s32.totalorder %s466_s16, %s3759_s21  ;;  %p3768_p7 = scmp.lt.s32.totalorder %s3759_s21, %s3759_s21 }
  0x70   : > { %p3762_p2 = pnand %p3760_p1, %p4047_p0  ;;  %p3769_p8 = por %p3768_p7, %p3767_p4 }
  0x72   : > { %p3763_p3 = pneg %p3762_p2 }
  0x74   : > { %p3770_p11 = pnand %p3769_p8, %p3763_p3 }
  0x76   : > { %3773 = shalt.err (!%p3770_p11)
}
  0x77   : > { %s4668_s30 = smov 16   ;;  %s4669_s17 = smov 256  }
  0x78   : > { %3316 = dma.hbm_to_vmem [thread:$0]  (!%p4035_p12), %s4627_s10, 8192, %s466_s16, [#allocation6], %s4669_s17, %s4669_s17, %s4668_s30  }
  0x79   : > { %s3774_s24 = scalar_lea.hbm %s4631_s14, 4096 }
  0x7a   : > { %p3775_p5 = scmp.ne.s32.totalorder %s4631_s14, %s3774_s24  ;;  %p3781_p10 = scmp.lt.u32.totalorder %s3774_s24, %s4631_s14 }
  0x7c   : > { %p3777_p6 = pnand %p3775_p5, %p4047_p0 }
  0x7e   : > { %p3778_p9 = pneg %p3777_p6 }
  0x80   : > { %p3783_p13 = pnand %p3781_p10, %p3778_p9 }
  0x82   : > { %3786 = shalt.err (!%p3783_p13)
}
  0x83   : > { %s3787_s29 = scalar_lea.vmem %s498_s27, 4096  ;;  %p3795_p4 = scmp.lt.s32.totalorder %s498_s27, %s498_s27 }
  0x84   : > { %p3788_p1 = scmp.ne.s32.totalorder %s498_s27, %s3787_s29  ;;  %p3796_p7 = scmp.lt.s32.totalorder %s3787_s29, %s3787_s29 }
  0x86   : > { %p3790_p2 = pnand %p3788_p1, %p4047_p0  ;;  %p3797_p8 = por %p3796_p7, %p3795_p4 }
  0x88   : > { %p3791_p3 = pneg %p3790_p2 }
  0x8a   : > { %p3798_p11 = pnand %p3797_p8, %p3791_p3 }
  0x8c   : > { %3801 = shalt.err (!%p3798_p11)
}
  0x8d   : > { %s3887_s16 = smov 64   ;;  %s3888_s21 = smov 4  }
  0x8e   : > { %3322 = dma.hbm_to_vmem [thread:$0]  (!%p4035_p12), %s4631_s14, 4096, %s498_s27, [#allocation9], %s3887_s16, %s3887_s16, %s3888_s21  }
  0x8f   : > { %p4670_p5 = scmp.ne.s32.totalorder %s4665_s18, 0 }
  0x90   : > { %p4671_p6 = scmp.eq.s32.totalorder (!%p4670_p5), %s3999_s25, 0 }
  0x91   : > { %534 = sbr.rel (%p4670_p5) target bundleno = 1085 (0x43d), region = 84 }
  0x98   : > { %3847 = dma.done.wait (%p4671_p6), [#allocation3], 2048   ;;  %p4672_p0 = pmov %p4671_p6 }
  0x9a   : > { %3849 = vsyncadd (%p4672_p0), [#allocation3], 4294965248  ;;  %p4673_p9 = pmov %p4672_p0 }
  0x9b   : > { %p4674_p10 = pmov %p4672_p0 }
  0x9c   : > { %3851 = dma.done.wait (%p4673_p9), [#allocation6], 10240  }
  0x9d   : > { %3853 = vsyncadd (%p4674_p10), [#allocation6], 4294957056  ;;  %p4675_p13 = pmov %p4672_p0 }
  0x9e   : > { %p4676_p12 = pmov %p4672_p0 }
  0x9f   : > { %3855 = dma.done.wait (%p4675_p13), [#allocation9], 12288  }
  0xa0   : > { %3857 = vsyncadd (%p4676_p12), [#allocation9], 4294955008  ;;  %s3005_s18 = sshll.u32 %s3999_s25, 2  ;;  %v3889_v0 = vmov 0   ;;  %s4677_s15 = sld [smem:[#allocation24_spill]] }
  0xa1   : > { %3384 = vset.pattern.permute.xlu0 %v3889_v0  ;;  %p606_p1 = scmp.lt.s32.totalorder %s3005_s18, 7  ;;  %3385 = vset.pattern.permute.xlu1 %v3889_v0  ;;  %v3386_v5 = vld [vmem:[#allocation2 + $0x4] ss:$8 sps:$4 sm:$0xff]   ;;  %v3390_v7 = vld [vmem:[#allocation2] ss:$8 sps:$4 sm:$0xff]   ;;  %s4680_s23 = sld [smem:[#allocation17_spill]] }
  0xa2   : > { %1072 = vmatprep.mubr.bf16.mxu1 %v3889_v0  ;;  %834 = vmatprep.mubr.bf16.mxu0 %v3889_v0  ;;  %v3388_v6 = vld [vmem:[#allocation5 + $0x4] ss:$8 sps:$4 sm:$0xff]   ;;  %v3391_v8 = vld [vmem:[#allocation5] ss:$8 sps:$4 sm:$0xff]   ;;  %v3392_v9 = vld [vmem:[#allocation2 + $0x14] ss:$8 sps:$4 sm:$0xff]  }
  0xa3   : > { %s4694_s18 = smov (!%p606_p1, %s3005_s18), 7  ;;  %1040 = vmatprep.subr.bf16.mxu1 %v3386_v5  ;;  %v3394_v10 = vld [vmem:[#allocation5 + $0x14] ss:$8 sps:$4 sm:$0xff]   ;;  %802 = vmatprep.subr.bf16.mxu0 %v3388_v6  ;;  %v3396_v11 = vld [vmem:[#allocation2 + $0x10] ss:$8 sps:$4 sm:$0xff]   ;;  %s4681_s29 = sld [smem:[#allocation27_spill]] }
  0xa4   : > { %s3006_s26 = sshll.u32 %s4694_s18, 3  ;;  %1041 = vmatpush1.bf16.msra.mxu1 %v3390_v7  ;;  %v3397_v12 = vld [vmem:[#allocation5 + $0x10] ss:$8 sps:$4 sm:$0xff]   ;;  %803 = vmatpush1.bf16.msra.mxu0 %v3391_v8  ;;  %v3398_v13 = vld [vmem:[#allocation2 + $0x24] ss:$8 sps:$4 sm:$0xff]   ;;  %s3008_s13 = sshll.u32 %s4694_s18, 2 }
  0xa5   : > { %1042 = vmatprep.subr.bf16.mxu1 %v3392_v9  ;;  %804 = vmatprep.subr.bf16.mxu0 %v3394_v10  ;;  %v3400_v14 = vld [vmem:[#allocation5 + $0x24] ss:$8 sps:$4 sm:$0xff]   ;;  %v3402_v15 = vld [vmem:[#allocation2 + $0x20] ss:$8 sps:$4 sm:$0xff]   ;;  %v3404_v17 = vld [vmem:[#allocation2 + $0x34] ss:$8 sps:$4 sm:$0xff]   ;;  %s615_s28 = scalar_lea.vmem %s4618_s1, %s3008_s13 }
  0xa6   : > { %s609_s22 = scalar_lea.vmem %s4677_s15, %s3006_s26  ;;  %v3403_v16 = vld [vmem:[#allocation5 + $0x20] ss:$8 sps:$4 sm:$0xff]   ;;  %v3406_v18 = vld [vmem:[#allocation5 + $0x34] ss:$8 sps:$4 sm:$0xff]   ;;  %v3408_v19 = vld [vmem:[#allocation2 + $0x30] ss:$8 sps:$4 sm:$0xff]  }
  0xa7   : > { %v619_v1 = vld [vmem:[%s609_s22] sm:$0xff]  ;;  %v620_v2 = vld [vmem:[%s609_s22 + $0x8] sm:$0xff]  ;;  %v621_v3 = vld [vmem:[%s609_s22 + $0x10] sm:$0xff]  ;;  %s4678_s13 = sld [smem:[#allocation26_spill]]  ;;  %s602_s16 = sand.u32 1, %s4680_s23  }
  0xa8   : > { %633 = vperm.xlu0 %3384, %v619_v1   ;;  %639 = vperm.xlu1 %3385, %v621_v3   ;;  %v622_v4 = vld [vmem:[%s609_s22 + $0x18] sm:$0xff]  ;;  %v3410_v21 = vld [vmem:[#allocation2 + $0x44] ss:$8 sps:$4 sm:$0xff]   ;;  %v3414_v23 = vld [vmem:[#allocation2 + $0x40] ss:$8 sps:$4 sm:$0xff]   ;;  %v644_v1 = vlaneseq  ;;  %s3004_s21 = sshll.u32 %s602_s16, 4 }
  0xa9   : > { %1043 = vmatpush1.bf16.msra.mxu1 %v3396_v11  ;;  %805 = vmatpush1.bf16.msra.mxu0 %v3397_v12  ;;  %v3409_v20 = vld [vmem:[#allocation5 + $0x30] ss:$8 sps:$4 sm:$0xff]   ;;  %v3412_v22 = vld [vmem:[#allocation5 + $0x44] ss:$8 sps:$4 sm:$0xff]   ;;  %v3415_v24 = vld [vmem:[#allocation5 + $0x40] ss:$8 sps:$4 sm:$0xff]  }
  0xaa   : > { %1044 = vmatprep.subr.bf16.mxu1 %v3398_v13  ;;  %806 = vmatprep.subr.bf16.mxu0 %v3400_v14  ;;  %v3416_v25 = vld [vmem:[#allocation2 + $0x54] ss:$8 sps:$4 sm:$0xff]   ;;  %v3420_v27 = vld [vmem:[#allocation2 + $0x50] ss:$8 sps:$4 sm:$0xff]   ;;  %v3422_v29 = vld [vmem:[#allocation2 + $0x64] ss:$8 sps:$4 sm:$0xff]  }
  0xab   : > { %v3418_v26 = vld [vmem:[#allocation5 + $0x54] ss:$8 sps:$4 sm:$0xff]   ;;  %v3421_v28 = vld [vmem:[#allocation5 + $0x50] ss:$8 sps:$4 sm:$0xff]   ;;  %v3424_v30 = vld [vmem:[#allocation5 + $0x64] ss:$8 sps:$4 sm:$0xff]  }
  0xac   : > { %636 = vperm.xlu0 %3384, %v620_v2   ;;  %642 = vperm.xlu1 %3385, %v622_v4   ;;  %v3426_v31 = vld [vmem:[#allocation2 + $0x60] ss:$8 sps:$4 sm:$0xff]   ;;  %v3428_v33 = vld [vmem:[#allocation2 + $0x74] ss:$8 sps:$4 sm:$0xff]   ;;  %v3432_v35 = vld [vmem:[#allocation2 + $0x70] ss:$8 sps:$4 sm:$0xff]  }
  0xad   : > { %1045 = vmatpush1.bf16.msra.mxu1 %v3402_v15  ;;  %807 = vmatpush1.bf16.msra.mxu0 %v3403_v16  ;;  %v3427_v32 = vld [vmem:[#allocation5 + $0x60] ss:$8 sps:$4 sm:$0xff]   ;;  %v3430_v34 = vld [vmem:[#allocation5 + $0x74] ss:$8 sps:$4 sm:$0xff]   ;;  %v3433_v36 = vld [vmem:[#allocation5 + $0x70] ss:$8 sps:$4 sm:$0xff]  }
  0xae   : > { %1046 = vmatprep.subr.bf16.mxu1 %v3404_v17  ;;  %808 = vmatprep.subr.bf16.mxu0 %v3406_v18  ;;  %v3441_v37 = vld [vmem:[#allocation8 + $0xc] ss:$16 sps:$4 sm:$0xff]   ;;  %v4176_v38 = vld [vmem:[%s615_s28] sm:$0xff]   ;;  %v3439_v40 = vld [vmem:[#allocation8 + $0x8] ss:$16 sps:$4 sm:$0xff]   ;;  %v4183_v2 = vshrl.u32 %v644_v1, 7 }
  0xaf   : > { %v3438_v39 = vld [vmem:[#allocation8 + $0x4] ss:$16 sps:$4 sm:$0xff]   ;;  %v3447_v41 = vld [vmem:[#allocation8 + $0x2c] ss:$16 sps:$4 sm:$0xff]   ;;  %v3445_v42 = vld [vmem:[#allocation8 + $0x28] ss:$16 sps:$4 sm:$0xff]  }
  0xb0   : > { %v3453_v43 = vld [vmem:[#allocation8 + $0x4c] ss:$16 sps:$4 sm:$0xff]   ;;  %v3451_v45 = vld [vmem:[#allocation8 + $0x48] ss:$16 sps:$4 sm:$0xff]   ;;  %v631_v3 = vld [vmem:[%s4619_s2] sm:$0x3] }
  0xb1   : > { %1047 = vmatpush1.bf16.msra.mxu1 %v3408_v19  ;;  %809 = vmatpush1.bf16.msra.mxu0 %v3409_v20  ;;  %v4180_v44 = vld [vmem:[%s615_s28 + $0x8] sm:$0xff]   ;;  %v4189_v4 = vsub.s32 0, %v4183_v2  ;;  %v4193_v6 = vsub.s32 1, %v4183_v2  ;;  %v1801_v11 = vsub.s32 4, %v4183_v2  ;;  %v4206_v14 = vld [vmem:[%s4622_s5] sm:$0xff]  ;;  %v1849_v19 = vsub.s32 5, %v4183_v2 }
  0xb2   : > { %1048 = vmatprep.subr.bf16.mxu1 %v3410_v21  ;;  %810 = vmatprep.subr.bf16.mxu0 %v3412_v22  ;;  %v3459_v46 = vld [vmem:[#allocation8 + $0x6c] ss:$16 sps:$4 sm:$0xff]   ;;  %v3457_v47 = vld [vmem:[#allocation8 + $0x68] ss:$16 sps:$4 sm:$0xff]   ;;  %v627_v20 = vunpack.c.l.bf16 %v4176_v38  ;;  %v628_v21 = vunpack.c.h.bf16 %v4176_v38  ;;  %v3462_v1 = vld [vmem:[#allocation8 + $0x84] ss:$16 sps:$4 sm:$0xff]  }
  0xb3   : > { %v3465_v48 = vld [vmem:[#allocation8 + $0x8c] ss:$16 sps:$4 sm:$0xff]   ;;  %v3463_v49 = vld [vmem:[#allocation8 + $0x88] ss:$16 sps:$4 sm:$0xff]   ;;  %v647_v5 = vrot.slane %v631_v3, %v4189_v4  ;;  %v655_v7 = vrot.slane %v631_v3, %v4193_v6  ;;  %v1802_v22 = vrot.slane %v4206_v14, %v1801_v11  ;;  %s4679_s28 = sld [smem:[#allocation25_spill]]  ;;  %s604_s30 = scalar_lea.vmem [#allocation11], %s3004_s21 }
  0xb4   : > { %v3471_v50 = vld [vmem:[#allocation8 + $0xac] ss:$16 sps:$4 sm:$0xff]   ;;  %v3469_v51 = vld [vmem:[#allocation8 + $0xa8] ss:$16 sps:$4 sm:$0xff]   ;;  %s4682_s17 = sld [smem:[#allocation22_spill]]  ;;  %s2866_s18 = sshll.u32 %s604_s30, 4  ;;  %s4567_s18 = int_to_ptr.vmem [resolvable:$true] %s2866_s18 }
  0xb5   : > { %1049 = vmatpush1.bf16.msra.mxu1 %v3414_v23  ;;  %811 = vmatpush1.bf16.msra.mxu0 %v3415_v24  ;;  %v3477_v52 = vld [vmem:[#allocation8 + $0xcc] ss:$16 sps:$4 sm:$0xff]   ;;  %v3475_v53 = vld [vmem:[#allocation8 + $0xc8] ss:$16 sps:$4 sm:$0xff]   ;;  %v1805_v23 = vsub.s32 6, %v4183_v2  ;;  %s3217_s26 = sshll.u32 %s3999_s25, 8 }
  0xb6   : > { %1050 = vmatprep.subr.bf16.mxu1 %v3416_v25  ;;  %812 = vmatprep.subr.bf16.mxu0 %v3418_v26  ;;  %v3483_v54 = vld [vmem:[#allocation8 + $0xec] ss:$16 sps:$4 sm:$0xff]   ;;  %v3481_v55 = vld [vmem:[#allocation8 + $0xe8] ss:$16 sps:$4 sm:$0xff]   ;;  %s4683_s15 = sld [smem:[#allocation28_spill]]  ;;  %s3802_s0 = scalar_lea.vmem %s4567_s18, 256 }
  0xb7   : > { %v3489_v56 = vld [vmem:[#allocation8 + $0x10c] ss:$16 sps:$4 sm:$0xff]   ;;  %v3487_v57 = vld [vmem:[#allocation8 + $0x108] ss:$16 sps:$4 sm:$0xff]   ;;  %p3803_p2 = scmp.ne.s32.totalorder %s4567_s18, %s3802_s0  ;;  %s3890_s25 = smov [#allocation11]  }
  0xb8   : > { %v3495_v58 = vld [vmem:[#allocation8 + $0x12c] ss:$16 sps:$4 sm:$0xff]   ;;  %v3493_v59 = vld [vmem:[#allocation8 + $0x128] ss:$16 sps:$4 sm:$0xff]   ;;  %s3806_s24 = sshll.u32 %s3890_s25, 4  ;;  %s3807_s24 = int_to_ptr.vmem [resolvable:$false] %s3806_s24 }
  0xb9   : > { %1051 = vmatpush1.bf16.msra.mxu1 %v3420_v27  ;;  %813 = vmatpush1.bf16.msra.mxu0 %v3421_v28  ;;  %v3501_v60 = vld [vmem:[#allocation8 + $0x14c] ss:$16 sps:$4 sm:$0xff]   ;;  %v3499_v61 = vld [vmem:[#allocation8 + $0x148] ss:$16 sps:$4 sm:$0xff]   ;;  %v1853_v28 = vsub.s32 7, %v4183_v2  ;;  %p3809_p8 = scmp.lt.s32.totalorder %s4567_s18, %s3807_s24 }
  0xba   : > { %1052 = vmatprep.subr.bf16.mxu1 %v3422_v29  ;;  %814 = vmatprep.subr.bf16.mxu0 %v3424_v30  ;;  %v3507_v62 = vld [vmem:[#allocation8 + $0x16c] ss:$16 sps:$4 sm:$0xff]   ;;  %v3505_v63 = vld [vmem:[#allocation8 + $0x168] ss:$16 sps:$4 sm:$0xff]   ;;  %v1850_v30 = vrot.slane %v4206_v14, %v1849_v19  ;;  %v3472_v19 = vld [vmem:[#allocation8 + $0xc0] ss:$16 sps:$4 sm:$0xff]  }
  0xbb   : > { %p4684_p3 = scmp.ne.s32.totalorder %s4682_s17, 0 }
  0xbc   : > { %s4572_s22 = scalar_lea.hbm %s4683_s15, %s3217_s26 }
  0xbd   : > { %1053 = vmatpush1.bf16.msra.mxu1 %v3426_v31  ;;  %815 = vmatpush1.bf16.msra.mxu0 %v3427_v32  ;;  %v629_v31 = vunpack.c.l.bf16 %v4180_v44  ;;  %v630_v32 = vunpack.c.h.bf16 %v4180_v44  ;;  %p3804_p4 = pnand %p3803_p2, %p4684_p3 }
  0xbe   : > { %1054 = vmatprep.subr.bf16.mxu1 %v3428_v33  ;;  %816 = vmatprep.subr.bf16.mxu0 %v3430_v34  ;;  %v1818_v33 = vrot.slane %v1802_v22, %v4189_v4  ;;  %v1806_v34 = vrot.slane %v4206_v14, %v1805_v23  ;;  %v3486_v22 = vld [vmem:[#allocation8 + $0x104] ss:$16 sps:$4 sm:$0xff]   ;;  %v3484_v23 = vld [vmem:[#allocation8 + $0x100] ss:$16 sps:$4 sm:$0xff]  }
  0xbf   : > { %p3805_p7 = pneg %p3804_p4 }
  0xc1   : > { %1055 = vmatpush1.bf16.msra.mxu1 %v3432_v35  ;;  %817 = vmatpush1.bf16.msra.mxu0 %v3433_v36 }
  0xc2   : > { %1737 = vmatprep.subr.bf16.mxu1 %v3441_v37  ;;  %1684 = vmatprep.subr.bf16.mxu0 %v3438_v39  ;;  %v3436_v39 = vld [vmem:[#allocation8] ss:$16 sps:$4 sm:$0xff]  }
  0xc4   : > { %1073 = vmatmul.mubr.bf16.vlgmr.msra.gmra.mrb[0].mxu1 %v4176_v38 }
  0xc5   : > { %1082 = vmatprep.mubr.bf16.mxu1 %v3889_v0  ;;  %1738 = vmatpush1.bf16.msra.mxu1 %v3439_v40  ;;  %v1854_v40 = vrot.slane %v4206_v14, %v1853_v28  ;;  %v3504_v28 = vld [vmem:[#allocation8 + $0x164] ss:$16 sps:$4 sm:$0xff]  }
  0xc6   : > { %1739 = vmatprep.subr.bf16.mxu1 %v3447_v41 }
  0xc9   : > { %1740 = vmatpush1.bf16.msra.mxu1 %v3445_v42  ;;  %v3444_v42 = vld [vmem:[#allocation8 + $0x24] ss:$16 sps:$4 sm:$0xff]  }
  0xca   : > { %1741 = vmatprep.subr.bf16.mxu1 %v3453_v43  ;;  %v1866_v43 = vrot.slane %v1850_v30, %v4193_v6  ;;  %v3510_v30 = vld [vmem:[#allocation8 + $0x184] ss:$16 sps:$4 sm:$0xff]  }
  0xcc   : > { %1083 = vmatmul.mubr.bf16.gmra.mrb[4].mxu1 %v4180_v44 }
  0xcd   : > { %1742 = vmatpush1.bf16.msra.mxu1 %v3451_v45  ;;  %v1822_v45 = vrot.slane %v1806_v34, %v4189_v4  ;;  %v3516_v34 = vld [vmem:[#allocation8 + $0x1a4] ss:$16 sps:$4 sm:$0xff]  }
  0xce   : > { %1743 = vmatprep.subr.bf16.mxu1 %v3459_v46 }
  0xd1   : > { %1744 = vmatpush1.bf16.msra.mxu1 %v3457_v47 }
  0xd2   : > { %1745 = vmatprep.subr.bf16.mxu1 %v3465_v48  ;;  %v3442_v48 = vld [vmem:[#allocation8 + $0x20] ss:$16 sps:$4 sm:$0xff]  }
  0xd5   : > { %1746 = vmatpush1.bf16.msra.mxu1 %v3463_v49  ;;  %v1870_v49 = vrot.slane %v1854_v40, %v4193_v6  ;;  %v3520_v40 = vld [vmem:[#allocation8 + $0x1c0] ss:$16 sps:$4 sm:$0xff]  }
  0xd6   : > { %1747 = vmatprep.subr.bf16.mxu1 %v3471_v50  ;;  %v3450_v50 = vld [vmem:[#allocation8 + $0x44] ss:$16 sps:$4 sm:$0xff]  }
  0xd9   : > { %1748 = vmatpush1.bf16.msra.mxu1 %v3469_v51 }
  0xda   : > { %1749 = vmatprep.subr.bf16.mxu1 %v3477_v52 }
  0xdd   : > { %1750 = vmatpush1.bf16.msra.mxu1 %v3475_v53 }
  0xde   : > { %1751 = vmatprep.subr.bf16.mxu1 %v3483_v54  ;;  %v3448_v54 = vld [vmem:[#allocation8 + $0x40] ss:$16 sps:$4 sm:$0xff]  }
  0xe1   : > { %1752 = vmatpush1.bf16.msra.mxu1 %v3481_v55 }
  0xe2   : > { %1753 = vmatprep.subr.bf16.mxu1 %v3489_v56 }
  0xe5   : > { %1754 = vmatpush1.bf16.msra.mxu1 %v3487_v57  ;;  %v3456_v57 = vld [vmem:[#allocation8 + $0x64] ss:$16 sps:$4 sm:$0xff]  }
  0xe6   : > { %1755 = vmatprep.subr.bf16.mxu1 %v3495_v58 }
  0xe9   : > { %1756 = vmatpush1.bf16.msra.mxu1 %v3493_v59 }
  0xea   : > { %1757 = vmatprep.subr.bf16.mxu1 %v3501_v60 }
  0xed   : > { %1758 = vmatpush1.bf16.msra.mxu1 %v3499_v61 }
  0xee   : > { %1759 = vmatprep.subr.bf16.mxu1 %v3507_v62  ;;  %v3454_v62 = vld [vmem:[#allocation8 + $0x60] ss:$16 sps:$4 sm:$0xff]  }
  0xf1   : > { %1760 = vmatpush1.bf16.msra.mxu1 %v3505_v63 }
 0x127   : > { %v4196_v8 = vpop.permute.xlu0 %633  ;;  %v4198_v9 = vpop.permute.xlu1 %639 }
 0x128   : > { %v648_v10 = vxor.u32 %v647_v5, %v4196_v8  ;;  %v650_v13 = vxor.u32 %v647_v5, %v4198_v9  ;;  %v1825_v47 = vxor.u32 %v1818_v33, %v4196_v8  ;;  %v1826_v52 = vxor.u32 %v1822_v45, %v4196_v8 }
 0x129   : > { %v1833_v58 = vxor.u32 %v1818_v33, %v4198_v9  ;;  %v1834_v63 = vxor.u32 %v1822_v45, %v4198_v9 }
 0x12a   : > { %v656_v12 = vadd.s32 %v655_v7, %v648_v10  ;;  %v658_v26 = vadd.s32 %v655_v7, %v650_v13  ;;  %v4231_v51 = vadd.s32 %v1866_v43, %v1825_v47  ;;  %v4234_v55 = vadd.s32 %v1870_v49, %v1826_v52  ;;  %v3460_v10 = vld [vmem:[#allocation8 + $0x80] ss:$16 sps:$4 sm:$0xff]   ;;  %v3537_v47 = vld [vmem:[#allocation7 + $0xc] ss:$16 sps:$4 sm:$0xff]  }
 0x12b   : > { %v4208_v15 = vpop.permute.xlu0 %636  ;;  %v4210_v16 = vpop.permute.xlu1 %642  ;;  %v4243_v61 = vadd.s32 %v1866_v43, %v1833_v58  ;;  %v4246_v3 = vadd.s32 %v1870_v49, %v1834_v63  ;;  %v4274_v58 = vsub.s32 2, %v4183_v2 }
 0x12c   : > { %v649_v17 = vxor.u32 %v647_v5, %v4208_v15  ;;  %v651_v18 = vxor.u32 %v647_v5, %v4210_v16  ;;  %v660_v25 = vand.u32 2147483648, %v656_v12  ;;  %v662_v37 = vand.u32 2147483648, %v658_v26  ;;  %v3468_v12 = vld [vmem:[#allocation8 + $0xa4] ss:$16 sps:$4 sm:$0xff]  }
 0x12d   : > { %v1829_v56 = vxor.u32 %v1818_v33, %v4208_v15  ;;  %v1837_v5 = vxor.u32 %v1818_v33, %v4210_v16  ;;  %v3498_v26 = vld [vmem:[#allocation8 + $0x144] ss:$16 sps:$4 sm:$0xff]   ;;  %v3511_v33 = vld [vmem:[#allocation8 + $0x188] ss:$16 sps:$4 sm:$0xff]  }
 0x12e   : > { %v657_v24 = vadd.s32 %v655_v7, %v649_v17  ;;  %v659_v27 = vadd.s32 %v655_v7, %v651_v18  ;;  %v668_v35 = vxor.u32 %v660_v25, %v627_v20  ;;  %v670_v46 = vxor.u32 %v662_v37, %v629_v31  ;;  %v3466_v17 = vld [vmem:[#allocation8 + $0xa0] ss:$16 sps:$4 sm:$0xff]   ;;  %v3474_v18 = vld [vmem:[#allocation8 + $0xc4] ss:$16 sps:$4 sm:$0xff]   ;;  %v3513_v31 = vld [vmem:[#allocation8 + $0x18c] ss:$16 sps:$4 sm:$0xff]  }
 0x12f   : > { %v4239_v59 = vadd.s32 %v1866_v43, %v1829_v56  ;;  %v1838_v7 = vxor.u32 %v1822_v45, %v4210_v16  ;;  %v4250_v11 = vadd.s32 %v1866_v43, %v1837_v5  ;;  %v3480_v20 = vld [vmem:[#allocation8 + $0xe4] ss:$16 sps:$4 sm:$0xff]   ;;  %v3490_v25 = vld [vmem:[#allocation8 + $0x120] ss:$16 sps:$4 sm:$0xff]   ;;  %1761 = vmatprep.subr.bf16.mxu1 %v3513_v31  ;;  %v3517_v37 = vld [vmem:[#allocation8 + $0x1a8] ss:$16 sps:$4 sm:$0xff]  }
 0x130   : > { %v661_v29 = vand.u32 2147483648, %v657_v24  ;;  %v663_v38 = vand.u32 2147483648, %v659_v27  ;;  %v3492_v24 = vld [vmem:[#allocation8 + $0x124] ss:$16 sps:$4 sm:$0xff]   ;;  %v3496_v27 = vld [vmem:[#allocation8 + $0x140] ss:$16 sps:$4 sm:$0xff]   ;;  %1762 = vmatpush1.bf16.msra.mxu1 %v3511_v33 }
 0x131   : > { %v4252_v13 = vadd.s32 %v1870_v49, %v1838_v7  ;;  %v3531_v43 = vld [vmem:[#allocation8 + $0x1ec] ss:$16 sps:$4 sm:$0xff]   ;;  %v4283_v7 = vsub.s32 3, %v4183_v2  ;;  %v936_v31 = vld [vmem:[%s4624_s7] sm:$0x3] }
 0x132   : > { %v669_v36 = vxor.u32 %v661_v29, %v628_v21  ;;  %v671_v44 = vxor.u32 %v663_v38, %v630_v32  ;;  %v3478_v21 = vld [vmem:[#allocation8 + $0xe0] ss:$16 sps:$4 sm:$0xff]   ;;  %v3522_v38 = vld [vmem:[#allocation8 + $0x1c4] ss:$16 sps:$4 sm:$0xff]  }
 0x133   : > { %v3502_v29 = vld [vmem:[#allocation8 + $0x160] ss:$16 sps:$4 sm:$0xff]  }
 0x134   : > { %v676_v41 = vpack.c.bf16 %v669_v36, %v668_v35  ;;  %v677_v53 = vpack.c.bf16 %v671_v44, %v670_v46  ;;  %v3508_v32 = vld [vmem:[#allocation8 + $0x180] ss:$16 sps:$4 sm:$0xff]   ;;  %v3519_v35 = vld [vmem:[#allocation8 + $0x1ac] ss:$16 sps:$4 sm:$0xff]   ;;  %v3529_v46 = vld [vmem:[#allocation8 + $0x1e8] ss:$16 sps:$4 sm:$0xff]  }
 0x135   : > { %v3514_v36 = vld [vmem:[#allocation8 + $0x1a0] ss:$16 sps:$4 sm:$0xff]   ;;  %1763 = vmatprep.subr.bf16.mxu1 %v3519_v35  ;;  %v3534_v44 = vld [vmem:[#allocation7 + $0x4] ss:$16 sps:$4 sm:$0xff]  }
 0x136   : > { %835 = vmatmul.mubr.bf16.vlgmr.msra.gmra.mrb[0].mxu0 %v676_v41  ;;  %1764 = vmatpush1.bf16.msra.mxu1 %v3517_v37  ;;  %v3523_v41 = vld [vmem:[#allocation8 + $0x1c8] ss:$16 sps:$4 sm:$0xff]  }
 0x137   : > { %844 = vmatprep.mubr.bf16.mxu0 %v3889_v0  ;;  %1685 = vmatpush1.bf16.msra.mxu0 %v3436_v39  ;;  %v1830_v0 = vxor.u32 %v1822_v45, %v4208_v15  ;;  %v3525_v39 = vld [vmem:[#allocation8 + $0x1cc] ss:$16 sps:$4 sm:$0xff]   ;;  %v3526_v45 = vld [vmem:[#allocation8 + $0x1e0] ss:$16 sps:$4 sm:$0xff]  }
 0x138   : > { %1686 = vmatprep.subr.bf16.mxu0 %v3444_v42  ;;  %1765 = vmatprep.subr.bf16.mxu1 %v3525_v39  ;;  %v3528_v42 = vld [vmem:[#allocation8 + $0x1e4] ss:$16 sps:$4 sm:$0xff]  }
 0x139   : > { %v4241_v60 = vadd.s32 %v1870_v49, %v1830_v0  ;;  %v855_v0 = vld [vmem:[%s4620_s3] sm:$0xf] }
 0x13a   : > { %1766 = vmatpush1.bf16.msra.mxu1 %v3523_v41  ;;  %v859_v63 = vrot.slane %v855_v0, %v4189_v4  ;;  %v863_v5 = vrot.slane %v855_v0, %v4274_v58 }
 0x13b   : > { %1687 = vmatpush1.bf16.msra.mxu0 %v3442_v48  ;;  %1767 = vmatprep.subr.bf16.mxu1 %v3531_v43  ;;  %v941_v43 = vrot.slane %v936_v31, %v4189_v4 }
 0x13c   : > { %1688 = vmatprep.subr.bf16.mxu0 %v3450_v50 }
 0x13e   : > { %845 = vmatmul.mubr.bf16.gmra.mrb[4].mxu0 %v677_v53  ;;  %1768 = vmatpush1.bf16.msra.mxu1 %v3529_v46 }
 0x13f   : > { %1689 = vmatpush1.bf16.msra.mxu0 %v3448_v54  ;;  %2346 = vmatprep.subr.bf16.mxu1 %v3537_v47 }
 0x140   : > { %1690 = vmatprep.subr.bf16.mxu0 %v3456_v57 }
 0x143   : > { %1691 = vmatpush1.bf16.msra.mxu0 %v3454_v62  ;;  %v1129_v62 = vld [vmem:[%s4621_s4] sm:$0xf] }
 0x144   : > { %1692 = vmatprep.subr.bf16.mxu0 %v3462_v1  ;;  %v1133_v1 = vrot.slane %v1129_v62, %v4189_v4 }
 0x147   : > { %1693 = vmatpush1.bf16.msra.mxu0 %v3460_v10  ;;  %v867_v10 = vrot.slane %v859_v63, %v4189_v4 }
 0x148   : > { %1694 = vmatprep.subr.bf16.mxu0 %v3468_v12  ;;  %v883_v12 = vrot.slane %v855_v0, %v4193_v6 }
 0x149   : > { %v872_v2 = vxor.u32 %v867_v10, %v4196_v8 }
 0x14b   : > { %1695 = vmatpush1.bf16.msra.mxu0 %v3466_v17  ;;  %v1137_v17 = vrot.slane %v1129_v62, %v4274_v58 }
 0x14c   : > { %1696 = vmatprep.subr.bf16.mxu0 %v3474_v18  ;;  %v1157_v18 = vrot.slane %v1129_v62, %v4193_v6 }
 0x14f   : > { %1697 = vmatpush1.bf16.msra.mxu0 %v3472_v19  ;;  %v4290_v19 = vrot.slane %v1133_v1, %v4189_v4 }
 0x150   : > { %1698 = vmatprep.subr.bf16.mxu0 %v3480_v20  ;;  %v871_v20 = vrot.slane %v863_v5, %v4189_v4 }
 0x151   : > { %v1148_v37 = vxor.u32 %v4290_v19, %v4208_v15 }
 0x152   : > { %v877_v35 = vxor.u32 %v871_v20, %v4198_v9  ;;  %v879_v46 = vxor.u32 %v871_v20, %v4210_v16 }
 0x153   : > { %1699 = vmatpush1.bf16.msra.mxu0 %v3478_v21  ;;  %v887_v21 = vrot.slane %v855_v0, %v4283_v7 }
 0x154   : > { %1700 = vmatprep.subr.bf16.mxu0 %v3486_v22  ;;  %v1161_v22 = vrot.slane %v1129_v62, %v4283_v7 }
 0x157   : > { %1701 = vmatpush1.bf16.msra.mxu0 %v3484_v23  ;;  %v891_v23 = vrot.slane %v883_v12, %v4193_v6  ;;  %v1150_v12 = vxor.u32 %v4290_v19, %v4198_v9 }
 0x158   : > { %1702 = vmatprep.subr.bf16.mxu0 %v3492_v24  ;;  %v1145_v24 = vrot.slane %v1137_v17, %v4189_v4 }
 0x159   : > { %v896_v33 = vadd.s32 %v891_v23, %v872_v2 }
 0x15b   : > { %1703 = vmatpush1.bf16.msra.mxu0 %v3490_v25  ;;  %v1165_v25 = vrot.slane %v1157_v18, %v4193_v6  ;;  %v904_v47 = vand.u32 2147483648, %v896_v33 }
 0x15c   : > { %1704 = vmatprep.subr.bf16.mxu0 %v3498_v26  ;;  %v1146_v26 = vxor.u32 %v4290_v19, %v4196_v8 }
 0x15d   : > { %v4332_v1 = vadd.s32 %v1165_v25, %v1148_v37 }
 0x15e   : > { %v4317_v39 = vadd.s32 %v1165_v25, %v1146_v26 }
 0x15f   : > { %1705 = vmatpush1.bf16.msra.mxu0 %v3496_v27  ;;  %v873_v27 = vxor.u32 %v871_v20, %v4196_v8 }
 0x160   : > { %1706 = vmatprep.subr.bf16.mxu0 %v3504_v28  ;;  %v895_v28 = vrot.slane %v887_v21, %v4193_v6  ;;  %v1178_v17 = vand.u32 2147483648, %v4317_v39 }
 0x162   : > { %v4328_v62 = vadd.s32 %v895_v28, %v877_v35  ;;  %v4345_v26 = vadd.s32 %v895_v28, %v879_v46  ;;  %v1152_v35 = vxor.u32 %v4290_v19, %v4210_v16 }
 0x163   : > { %1707 = vmatpush1.bf16.msra.mxu0 %v3502_v29  ;;  %v876_v29 = vxor.u32 %v867_v10, %v4198_v9 }
 0x164   : > { %1708 = vmatprep.subr.bf16.mxu0 %v3510_v30  ;;  %v1169_v30 = vrot.slane %v1161_v22, %v4193_v6  ;;  %v945_v22 = vrot.slane %v936_v31, %v4193_v6  ;;  %v909_v33 = vand.u32 2147483648, %v4328_v62 }
 0x165   : > { %v4319_v41 = vadd.s32 %v891_v23, %v876_v29 }
 0x167   : > { %1709 = vmatpush1.bf16.msra.mxu0 %v3508_v32  ;;  %v710_v32 = vld [vmem:[%s4626_s9] sm:$0x3] }
 0x168   : > { %1710 = vmatprep.subr.bf16.mxu0 %v3516_v34  ;;  %v874_v34 = vxor.u32 %v867_v10, %v4208_v15  ;;  %v4343_v2 = vrot.slane %v710_v32, %v4193_v6 }
 0x16a   : > { %v898_v0 = vadd.s32 %v891_v23, %v874_v34  ;;  %v1153_v34 = vxor.u32 %v1145_v24, %v4210_v16 }
 0x16b   : > { %1711 = vmatpush1.bf16.msra.mxu0 %v3514_v36  ;;  %v1147_v36 = vxor.u32 %v1145_v24, %v4196_v8 }
 0x16c   : > { %1712 = vmatprep.subr.bf16.mxu0 %v3522_v38  ;;  %v875_v38 = vxor.u32 %v871_v20, %v4208_v15  ;;  %v908_v20 = vand.u32 2147483648, %v4319_v41  ;;  %v906_v29 = vand.u32 2147483648, %v898_v0  ;;  %v3532_v41 = vld [vmem:[#allocation7] ss:$16 sps:$4 sm:$0xff]  }
 0x16d   : > { %v4330_v63 = vadd.s32 %v1169_v30, %v1147_v36 }
 0x16e   : > { %v899_v5 = vadd.s32 %v895_v28, %v875_v38 }
 0x16f   : > { %1713 = vmatpush1.bf16.msra.mxu0 %v3520_v40  ;;  %v897_v40 = vadd.s32 %v895_v28, %v873_v27 }
 0x170   : > { %1714 = vmatprep.subr.bf16.mxu0 %v3528_v42  ;;  %v878_v42 = vxor.u32 %v867_v10, %v4210_v16  ;;  %v1151_v10 = vxor.u32 %v1145_v24, %v4198_v9  ;;  %v907_v37 = vand.u32 2147483648, %v899_v5  ;;  %v4367_v5 = vadd.s32 %v1169_v30, %v1153_v34 }
 0x171   : > { %v905_v18 = vand.u32 2147483648, %v897_v40 }
 0x172   : > { %v4339_v21 = vadd.s32 %v891_v23, %v878_v42  ;;  %v1180_v23 = vand.u32 2147483648, %v4332_v1  ;;  %v4354_v31 = vadd.s32 %v1169_v30, %v1151_v10  ;;  %v4369_v10 = vadd.s32 %v1165_v25, %v1152_v35 }
 0x173   : > { %1715 = vmatpush1.bf16.msra.mxu0 %v3526_v45  ;;  %v4324_v45 = vrot.slane %v710_v32, %v4189_v4  ;;  %v4356_v32 = vadd.s32 %v1165_v25, %v1150_v12 }
 0x174   : > { %2293 = vmatprep.subr.bf16.mxu0 %v3534_v44  ;;  %v1149_v44 = vxor.u32 %v1145_v24, %v4208_v15  ;;  %v910_v40 = vand.u32 2147483648, %v4339_v21  ;;  %v1179_v24 = vand.u32 2147483648, %v4330_v63 }
 0x175   : > { %v1182_v21 = vand.u32 2147483648, %v4356_v32 }
 0x176   : > { %v4347_v27 = vadd.s32 %v1169_v30, %v1149_v44  ;;  %v911_v44 = vand.u32 2147483648, %v4345_v26 }
 0x178   : > { %v1181_v0 = vand.u32 2147483648, %v4347_v27 }
 0x197   : > { %v4254_v48 = vpop.f32.mrb[0].mxu1 }
 0x198   : > { %v4256_v49 = vpop.f32.mrb[1].mxu1  ;;  %v1075_v28 = vadd.f32 %v4254_v48, %v941_v43 }
 0x199   : > { %v4258_v50 = vpop.f32.mrb[2].mxu1  ;;  %v1077_v42 = vadd.f32 %v4256_v49, %v945_v22  ;;  %v1183_v49 = vand.u32 2147483648, %v4354_v31  ;;  %v3544_v31 = vld [vmem:[#allocation7 + $0x40] ss:$16 sps:$4 sm:$0xff]  }
 0x19a   : > { %v4260_v52 = vpop.f32.mrb[3].mxu1  ;;  %v1079_v26 = vadd.f32 %v4258_v50, %v941_v43 }
 0x19f   : > { %v4262_v53 = vpop.f32.mrb[4].mxu1 }
 0x1a0   : > { %v4264_v54 = vpop.f32.mrb[5].mxu1  ;;  %v1085_v30 = vadd.f32 %v4262_v53, %v941_v43 }
 0x1a1   : > { %v4266_v56 = vpop.f32.mrb[6].mxu1  ;;  %v1087_v25 = vadd.f32 %v4264_v54, %v945_v22 }
 0x1a2   : > { %v4268_v57 = vpop.f32.mrb[7].mxu1  ;;  %v1089_v35 = vadd.f32 %v4266_v56, %v941_v43 }
 0x1a3   : > { %v1091_v50 = vadd.f32 %v4268_v57, %v945_v22 }
 0x209   : > { %v836_v36 = vpop.f32.mrb[0].mxu0 }
 0x20a   : > { %v837_v38 = vadd.f32 %v836_v36, %v4324_v45  ;;  %v838_v39 = vpop.f32.mrb[1].mxu0 }
 0x20b   : > { %v839_v19 = vadd.f32 %v838_v39, %v4343_v2  ;;  %v840_v46 = vpop.f32.mrb[2].mxu0 }
 0x20c   : > { %v920_v62 = vxor.u32 %v904_v47, %v837_v38  ;;  %v841_v1 = vadd.f32 %v840_v46, %v4324_v45  ;;  %v842_v48 = vpop.f32.mrb[3].mxu0  ;;  %v1081_v47 = vadd.f32 %v4260_v52, %v945_v22 }
 0x20d   : > { %v921_v12 = vxor.u32 %v905_v18, %v839_v19  ;;  %v843_v63 = vadd.f32 %v842_v48, %v4343_v2 }
 0x20e   : > { %v1093_v36 = vadd.f32 %v1075_v28, %v920_v62  ;;  %v922_v39 = vxor.u32 %v906_v29, %v841_v1 }
 0x20f   : > { %v1094_v27 = vadd.f32 %v1077_v42, %v921_v12  ;;  %v923_v38 = vxor.u32 %v907_v37, %v843_v63 }
 0x210   : > { %vm1101_vm0 = vcmp.gt.f32.partialorder %v1093_v36, 0.0  ;;  %v1109_v18 = vmul.f32 0.01, %v1093_v36  ;;  %v1095_v34 = vadd.f32 %v1079_v26, %v922_v39 }
 0x211   : > { %vm1102_vm1 = vcmp.gt.f32.partialorder %v1094_v27, 0.0  ;;  %v1110_v19 = vmul.f32 0.01, %v1094_v27  ;;  %v1096_v46 = vadd.f32 %v1081_v47, %v923_v38  ;;  %v846_v28 = vpop.f32.mrb[4].mxu0 }
 0x212   : > { %v1117_v29 = vsel %vm1101_vm0, %v1093_v36, %v1109_v18  ;;  %vm1103_vm2 = vcmp.gt.f32.partialorder %v1095_v34, 0.0  ;;  %v1111_v52 = vmul.f32 0.01, %v1095_v34  ;;  %v847_v37 = vadd.f32 %v846_v28, %v4324_v45  ;;  %v848_v42 = vpop.f32.mrb[5].mxu0 }
 0x213   : > { %v1194_v53 = vxor.u32 %v1178_v17, %v1117_v29  ;;  %vm1104_vm3 = vcmp.gt.f32.partialorder %v1096_v46, 0.0  ;;  %v1112_v54 = vmul.f32 0.01, %v1096_v46  ;;  %v849_v62 = vadd.f32 %v848_v42, %v4343_v2  ;;  %v850_v1 = vpop.f32.mrb[6].mxu0  ;;  %v3538_v42 = vld [vmem:[#allocation7 + $0x20] ss:$16 sps:$4 sm:$0xff]  }
 0x214   : > { %v1119_v48 = vsel %vm1103_vm2, %v1095_v34, %v1111_v52  ;;  %v924_v56 = vxor.u32 %v908_v20, %v847_v37  ;;  %v851_v43 = vadd.f32 %v850_v1, %v4324_v45  ;;  %v852_v12 = vpop.f32.mrb[7].mxu0  ;;  %v1118_v57 = vsel %vm1102_vm1, %v1094_v27, %v1110_v19  ;;  %v3535_v37 = vld [vmem:[#allocation7 + $0x8] ss:$16 sps:$4 sm:$0xff]   ;;  %v3546_v1 = vld [vmem:[#allocation7 + $0x44] ss:$16 sps:$4 sm:$0xff]  }
 0x215   : > { %v4386_v22 = vpack.c.bf16 %v1119_v48, %v1117_v29  ;;  %v1196_v63 = vxor.u32 %v1180_v23, %v1119_v48  ;;  %v925_v36 = vxor.u32 %v909_v33, %v849_v62  ;;  %v853_v17 = vadd.f32 %v852_v12, %v4343_v2  ;;  %v3540_v29 = vld [vmem:[#allocation7 + $0x24] ss:$16 sps:$4 sm:$0xff]   ;;  %v3549_v48 = vld [vmem:[#allocation7 + $0x4c] ss:$16 sps:$4 sm:$0xff]  }
 0x216   : > { %v926_v26 = vxor.u32 %v910_v40, %v851_v43  ;;  %v1097_v39 = vadd.f32 %v1085_v30, %v924_v56  ;;  %v1120_v47 = vsel %vm1104_vm3, %v1096_v46, %v1112_v54  ;;  %v1195_v38 = vxor.u32 %v1179_v24, %v1118_v57  ;;  %v3543_v40 = vld [vmem:[#allocation7 + $0x2c] ss:$16 sps:$4 sm:$0xff]   ;;  %v3552_v43 = vld [vmem:[#allocation7 + $0x64] ss:$16 sps:$4 sm:$0xff]  }
 0x217   : > { %v927_v18 = vxor.u32 %v911_v44, %v853_v17  ;;  %v1098_v34 = vadd.f32 %v1087_v25, %v925_v36  ;;  %v1197_v28 = vxor.u32 %v1181_v0, %v1120_v47  ;;  %v1210_v20 = vpack.c.bf16 %v1196_v63, %v1194_v53  ;;  %v3555_v12 = vld [vmem:[#allocation7 + $0x6c] ss:$16 sps:$4 sm:$0xff]   ;;  %v3553_v63 = vld [vmem:[#allocation7 + $0x68] ss:$16 sps:$4 sm:$0xff]   ;;  %v3558_v36 = vld [vmem:[#allocation7 + $0x84] ss:$16 sps:$4 sm:$0xff]  }
 0x218   : > { %vm1105_vm4 = vcmp.gt.f32.partialorder %v1097_v39, 0.0  ;;  %v1113_v45 = vmul.f32 0.01, %v1097_v39  ;;  %v1099_v52 = vadd.f32 %v1089_v35, %v926_v26  ;;  %v1126_v27 = vpack.c.bf16 %v1120_v47, %v1118_v57  ;;  %v3550_v57 = vld [vmem:[#allocation7 + $0x60] ss:$16 sps:$4 sm:$0xff]  }
 0x219   : > { %vm1106_vm5 = vcmp.gt.f32.partialorder %v1098_v34, 0.0  ;;  %v1114_v19 = vmul.f32 0.01, %v1098_v34  ;;  %v1100_v23 = vadd.f32 %v1091_v50, %v927_v18  ;;  %v1211_v33 = vpack.c.bf16 %v1197_v28, %v1195_v38  ;;  %v3561_v17 = vld [vmem:[#allocation7 + $0x8c] ss:$16 sps:$4 sm:$0xff]  }
 0x21a   : > { %vm1107_vm6 = vcmp.gt.f32.partialorder %v1099_v52, 0.0  ;;  %v1115_v2 = vmul.f32 0.01, %v1099_v52  ;;  %v1121_v30 = vsel %vm1105_vm4, %v1097_v39, %v1113_v45  ;;  %v1184_v24 = vand.u32 2147483648, %v4369_v10  ;;  %v3541_v10 = vld [vmem:[#allocation7 + $0x28] ss:$16 sps:$4 sm:$0xff]  }
 0x21b   : > { %vm1108_vm7 = vcmp.gt.f32.partialorder %v1100_v23, 0.0  ;;  %v1116_v44 = vmul.f32 0.01, %v1100_v23  ;;  %1716 = vmatprep.mubr.bf16.mxu0 %v1211_v33  ;;  %1769 = vmatprep.mubr.bf16.mxu1 %v1211_v33  ;;  %v1122_v0 = vsel %vm1106_vm5, %v1098_v34, %v1114_v19  ;;  %v1198_v25 = vxor.u32 %v1182_v21, %v1121_v30  ;;  %v3556_v26 = vld [vmem:[#allocation7 + $0x80] ss:$16 sps:$4 sm:$0xff]  }
 0x21c   : > { %1717 = vmatmul.mubr.bf16.vlgmr.msra.gmra.mrb[8].mxu0 %v1210_v20  ;;  %1770 = vmatmul.mubr.bf16.vlgmr.msra.gmra.mrb[8].mxu1 %v1210_v20  ;;  %v1185_v35 = vand.u32 2147483648, %v4367_v5  ;;  %v1199_v46 = vxor.u32 %v1183_v49, %v1122_v0  ;;  %v1123_v50 = vsel %vm1107_vm6, %v1099_v52, %v1115_v2  ;;  %v3547_v49 = vld [vmem:[#allocation7 + $0x48] ss:$16 sps:$4 sm:$0xff]   ;;  %v3564_v47 = vld [vmem:[#allocation7 + $0xa4] ss:$16 sps:$4 sm:$0xff]  }
 0x21d   : > { %2294 = vmatpush1.bf16.msra.mxu0 %v3532_v41  ;;  %2347 = vmatpush1.bf16.msra.mxu1 %v3535_v37  ;;  %v1124_v53 = vsel %vm1108_vm7, %v1100_v23, %v1116_v44  ;;  %v1200_v54 = vxor.u32 %v1184_v24, %v1123_v50  ;;  %v4395_v62 = vpack.c.bf16 %v1123_v50, %v1121_v30  ;;  %v3559_v39 = vld [vmem:[#allocation7 + $0x88] ss:$16 sps:$4 sm:$0xff]   ;;  %v3567_v38 = vld [vmem:[#allocation7 + $0xac] ss:$16 sps:$4 sm:$0xff]   ;;  %v3562_v18 = vld [vmem:[#allocation7 + $0xa0] ss:$16 sps:$4 sm:$0xff]  }
 0x21e   : > { %2295 = vmatprep.subr.bf16.mxu0 %v3540_v29  ;;  %2348 = vmatprep.subr.bf16.mxu1 %v3543_v40  ;;  %v1201_v32 = vxor.u32 %v1185_v35, %v1124_v53  ;;  %v4397_v21 = vpack.c.bf16 %v1124_v53, %v1122_v0  ;;  %v3565_v34 = vld [vmem:[#allocation7 + $0xa8] ss:$16 sps:$4 sm:$0xff]   ;;  %v3570_v28 = vld [vmem:[#allocation7 + $0xc4] ss:$16 sps:$4 sm:$0xff]   ;;  %v3573_v41 = vld [vmem:[#allocation7 + $0xcc] ss:$16 sps:$4 sm:$0xff]  }
 0x21f   : > { %v1212_v5 = vpack.c.bf16 %v1200_v54, %v1198_v25  ;;  %v3568_v20 = vld [vmem:[#allocation7 + $0xc0] ss:$16 sps:$4 sm:$0xff]   ;;  %v3571_v45 = vld [vmem:[#allocation7 + $0xc8] ss:$16 sps:$4 sm:$0xff]   ;;  %v3576_v52 = vld [vmem:[#allocation7 + $0xe4] ss:$16 sps:$4 sm:$0xff]  }
 0x220   : > { %v1213_v56 = vpack.c.bf16 %v1201_v32, %v1199_v46  ;;  %v3579_v37 = vld [vmem:[#allocation7 + $0xec] ss:$16 sps:$4 sm:$0xff]   ;;  %v3577_v19 = vld [vmem:[#allocation7 + $0xe8] ss:$16 sps:$4 sm:$0xff]   ;;  %v3582_v23 = vld [vmem:[#allocation7 + $0x104] ss:$16 sps:$4 sm:$0xff]  }
 0x221   : > { %2296 = vmatpush1.bf16.msra.mxu0 %v3538_v42  ;;  %2349 = vmatpush1.bf16.msra.mxu1 %v3541_v10  ;;  %v3585_v33 = vld [vmem:[#allocation7 + $0x10c] ss:$16 sps:$4 sm:$0xff]   ;;  %v3580_v29 = vld [vmem:[#allocation7 + $0x100] ss:$16 sps:$4 sm:$0xff]   ;;  %v3583_v2 = vld [vmem:[#allocation7 + $0x108] ss:$16 sps:$4 sm:$0xff]  }
 0x222   : > { %1726 = vmatprep.mubr.bf16.mxu0 %v1213_v56  ;;  %1779 = vmatprep.mubr.bf16.mxu1 %v1213_v56  ;;  %v3588_v40 = vld [vmem:[#allocation7 + $0x124] ss:$16 sps:$4 sm:$0xff]   ;;  %v3591_v30 = vld [vmem:[#allocation7 + $0x12c] ss:$16 sps:$4 sm:$0xff]   ;;  %v3586_v24 = vld [vmem:[#allocation7 + $0x120] ss:$16 sps:$4 sm:$0xff]  }
 0x223   : > { %2297 = vmatprep.subr.bf16.mxu0 %v3546_v1  ;;  %2350 = vmatprep.subr.bf16.mxu1 %v3549_v48  ;;  %v3589_v44 = vld [vmem:[#allocation7 + $0x128] ss:$16 sps:$4 sm:$0xff]   ;;  %v3594_v0 = vld [vmem:[#allocation7 + $0x144] ss:$16 sps:$4 sm:$0xff]   ;;  %v3597_v25 = vld [vmem:[#allocation7 + $0x14c] ss:$16 sps:$4 sm:$0xff]  }
 0x224   : > { %1727 = vmatmul.mubr.bf16.gmra.mrb[12].mxu0 %v1212_v5  ;;  %1780 = vmatmul.mubr.bf16.gmra.mrb[12].mxu1 %v1212_v5  ;;  %v3592_v35 = vld [vmem:[#allocation7 + $0x140] ss:$16 sps:$4 sm:$0xff]   ;;  %v3595_v46 = vld [vmem:[#allocation7 + $0x148] ss:$16 sps:$4 sm:$0xff]   ;;  %v3600_v50 = vld [vmem:[#allocation7 + $0x164] ss:$16 sps:$4 sm:$0xff]  }
 0x225   : > { %2298 = vmatpush1.bf16.msra.mxu0 %v3544_v31  ;;  %2351 = vmatpush1.bf16.msra.mxu1 %v3547_v49  ;;  %v3603_v42 = vld [vmem:[#allocation7 + $0x16c] ss:$16 sps:$4 sm:$0xff]   ;;  %v3598_v10 = vld [vmem:[#allocation7 + $0x160] ss:$16 sps:$4 sm:$0xff]   ;;  %v3601_v53 = vld [vmem:[#allocation7 + $0x168] ss:$16 sps:$4 sm:$0xff]  }
 0x226   : > { %2325 = vmatprep.mubr.bf16.mxu0 %v1126_v27  ;;  %2378 = vmatprep.mubr.bf16.mxu1 %v1126_v27  ;;  %v3574_v27 = vld [vmem:[#allocation7 + $0xe0] ss:$16 sps:$4 sm:$0xff]   ;;  %v3606_v54 = vld [vmem:[#allocation7 + $0x184] ss:$16 sps:$4 sm:$0xff]   ;;  %v3609_v32 = vld [vmem:[#allocation7 + $0x18c] ss:$16 sps:$4 sm:$0xff]  }
 0x227   : > { %2299 = vmatprep.subr.bf16.mxu0 %v3552_v43  ;;  %2352 = vmatprep.subr.bf16.mxu1 %v3555_v12  ;;  %v3604_v1 = vld [vmem:[#allocation7 + $0x180] ss:$16 sps:$4 sm:$0xff]   ;;  %v3607_v48 = vld [vmem:[#allocation7 + $0x188] ss:$16 sps:$4 sm:$0xff]   ;;  %v3612_v5 = vld [vmem:[#allocation7 + $0x1a4] ss:$16 sps:$4 sm:$0xff]  }
 0x228   : > { %v3615_v56 = vld [vmem:[#allocation7 + $0x1ac] ss:$16 sps:$4 sm:$0xff]   ;;  %v3610_v31 = vld [vmem:[#allocation7 + $0x1a0] ss:$16 sps:$4 sm:$0xff]   ;;  %v3613_v49 = vld [vmem:[#allocation7 + $0x1a8] ss:$16 sps:$4 sm:$0xff]  }
 0x229   : > { %2300 = vmatpush1.bf16.msra.mxu0 %v3550_v57  ;;  %2353 = vmatpush1.bf16.msra.mxu1 %v3553_v63  ;;  %v3618_v43 = vld [vmem:[#allocation7 + $0x1c4] ss:$16 sps:$4 sm:$0xff]   ;;  %v3621_v12 = vld [vmem:[#allocation7 + $0x1cc] ss:$16 sps:$4 sm:$0xff]   ;;  %v3616_v57 = vld [vmem:[#allocation7 + $0x1c0] ss:$16 sps:$4 sm:$0xff]  }
 0x22a   : > { %2301 = vmatprep.subr.bf16.mxu0 %v3558_v36  ;;  %2354 = vmatprep.subr.bf16.mxu1 %v3561_v17  ;;  %v3619_v63 = vld [vmem:[#allocation7 + $0x1c8] ss:$16 sps:$4 sm:$0xff]   ;;  %v3624_v36 = vld [vmem:[#allocation7 + $0x1e4] ss:$16 sps:$4 sm:$0xff]   ;;  %v3627_v17 = vld [vmem:[#allocation7 + $0x1ec] ss:$16 sps:$4 sm:$0xff]  }
 0x22d   : > { %2302 = vmatpush1.bf16.msra.mxu0 %v3556_v26  ;;  %2355 = vmatpush1.bf16.msra.mxu1 %v3559_v39  ;;  %v3622_v26 = vld [vmem:[#allocation7 + $0x1e0] ss:$16 sps:$4 sm:$0xff]   ;;  %v3625_v39 = vld [vmem:[#allocation7 + $0x1e8] ss:$16 sps:$4 sm:$0xff]  }
 0x22e   : > { %2303 = vmatprep.subr.bf16.mxu0 %v3564_v47  ;;  %2356 = vmatprep.subr.bf16.mxu1 %v3567_v38  ;;  %v3628_v47 = vld [vmem:[#allocation10 + $0x40] sm:$0xff]  }
 0x22f   : > { %v3629_v38 = vld [vmem:[#allocation10 + $0xc0] sm:$0xff]  }
 0x231   : > { %2304 = vmatpush1.bf16.msra.mxu0 %v3562_v18  ;;  %2357 = vmatpush1.bf16.msra.mxu1 %v3565_v34  ;;  %v3630_v18 = vld [vmem:[#allocation10] sm:$0xff]  }
 0x232   : > { %2305 = vmatprep.subr.bf16.mxu0 %v3570_v28  ;;  %2358 = vmatprep.subr.bf16.mxu1 %v3573_v41  ;;  %v3631_v34 = vld [vmem:[#allocation10 + $0x80] sm:$0xff]   ;;  %v3632_v28 = vld [vmem:[#allocation10 + $0x48] sm:$0xff]  }
 0x233   : > { %v3633_v41 = vld [vmem:[#allocation10 + $0xc8] sm:$0xff]  }
 0x235   : > { %2306 = vmatpush1.bf16.msra.mxu0 %v3568_v20  ;;  %2359 = vmatpush1.bf16.msra.mxu1 %v3571_v45  ;;  %v3634_v20 = vld [vmem:[#allocation10 + $0x8] sm:$0xff]   ;;  %v3636_v45 = vld [vmem:[#allocation10 + $0x50] sm:$0xff]  }
 0x236   : > { %2307 = vmatprep.subr.bf16.mxu0 %v3576_v52  ;;  %2360 = vmatprep.subr.bf16.mxu1 %v3579_v37  ;;  %v3638_v52 = vld [vmem:[#allocation10 + $0x10] sm:$0xff]   ;;  %v3640_v37 = vld [vmem:[#allocation10 + $0x58] sm:$0xff]  }
 0x239   : > { %2308 = vmatpush1.bf16.msra.mxu0 %v3574_v27  ;;  %2361 = vmatpush1.bf16.msra.mxu1 %v3577_v19  ;;  %v3641_v27 = vld [vmem:[#allocation10 + $0xd8] sm:$0xff]  }
 0x23a   : > { %2309 = vmatprep.subr.bf16.mxu0 %v3582_v23  ;;  %2362 = vmatprep.subr.bf16.mxu1 %v3585_v33  ;;  %v3642_v19 = vld [vmem:[#allocation10 + $0x18] sm:$0xff]   ;;  %v3644_v33 = vld [vmem:[#allocation10 + $0x60] sm:$0xff]  }
 0x23b   : > { %v3643_v23 = vld [vmem:[#allocation10 + $0x98] sm:$0xff]  }
 0x23d   : > { %2310 = vmatpush1.bf16.msra.mxu0 %v3580_v29  ;;  %2363 = vmatpush1.bf16.msra.mxu1 %v3583_v2  ;;  %v3645_v29 = vld [vmem:[#allocation10 + $0xe0] sm:$0xff]  }
 0x23e   : > { %2311 = vmatprep.subr.bf16.mxu0 %v3588_v40  ;;  %2364 = vmatprep.subr.bf16.mxu1 %v3591_v30  ;;  %v3646_v2 = vld [vmem:[#allocation10 + $0x20] sm:$0xff]   ;;  %v3648_v30 = vld [vmem:[#allocation10 + $0x68] sm:$0xff]  }
 0x23f   : > { %v3647_v40 = vld [vmem:[#allocation10 + $0xa0] sm:$0xff]  }
 0x241   : > { %2312 = vmatpush1.bf16.msra.mxu0 %v3586_v24  ;;  %2365 = vmatpush1.bf16.msra.mxu1 %v3589_v44  ;;  %v3649_v24 = vld [vmem:[#allocation10 + $0xe8] sm:$0xff]  }
 0x242   : > { %2313 = vmatprep.subr.bf16.mxu0 %v3594_v0  ;;  %2366 = vmatprep.subr.bf16.mxu1 %v3597_v25  ;;  %v3650_v44 = vld [vmem:[#allocation10 + $0x28] sm:$0xff]   ;;  %v3652_v25 = vld [vmem:[#allocation10 + $0x70] sm:$0xff]  }
 0x243   : > { %v3651_v0 = vld [vmem:[#allocation10 + $0xa8] sm:$0xff]  }
 0x245   : > { %2314 = vmatpush1.bf16.msra.mxu0 %v3592_v35  ;;  %2367 = vmatpush1.bf16.msra.mxu1 %v3595_v46  ;;  %v3653_v35 = vld [vmem:[#allocation10 + $0xf0] sm:$0xff]  }
 0x246   : > { %2315 = vmatprep.subr.bf16.mxu0 %v3600_v50  ;;  %2368 = vmatprep.subr.bf16.mxu1 %v3603_v42  ;;  %v3654_v46 = vld [vmem:[#allocation10 + $0x30] sm:$0xff]   ;;  %v3656_v42 = vld [vmem:[#allocation10 + $0x78] sm:$0xff]  }
 0x247   : > { %v3655_v50 = vld [vmem:[#allocation10 + $0xb0] sm:$0xff]  }
 0x249   : > { %2316 = vmatpush1.bf16.msra.mxu0 %v3598_v10  ;;  %2369 = vmatpush1.bf16.msra.mxu1 %v3601_v53  ;;  %v3657_v10 = vld [vmem:[#allocation10 + $0xf8] sm:$0xff]  }
 0x24a   : > { %2317 = vmatprep.subr.bf16.mxu0 %v3606_v54  ;;  %2370 = vmatprep.subr.bf16.mxu1 %v3609_v32  ;;  %v3658_v53 = vld [vmem:[#allocation10 + $0x38] sm:$0xff]   ;;  %v1794_v32 = vrot.slane %v4206_v14, %v4189_v4 }
 0x24b   : > { %v3659_v54 = vld [vmem:[#allocation10 + $0xb8] sm:$0xff]  }
 0x24d   : > { %2318 = vmatpush1.bf16.msra.mxu0 %v3604_v1  ;;  %2371 = vmatpush1.bf16.msra.mxu1 %v3607_v48  ;;  %v1798_v1 = vrot.slane %v4206_v14, %v4274_v58  ;;  %v1810_v48 = vrot.slane %v1794_v32, %v4189_v4 }
 0x24e   : > { %2319 = vmatprep.subr.bf16.mxu0 %v3612_v5  ;;  %2372 = vmatprep.subr.bf16.mxu1 %v3615_v56  ;;  %v1842_v5 = vrot.slane %v4206_v14, %v4193_v6 }
 0x24f   : > { %v1814_v56 = vrot.slane %v1798_v1, %v4189_v4 }
 0x251   : > { %2320 = vmatpush1.bf16.msra.mxu0 %v3610_v31  ;;  %2373 = vmatpush1.bf16.msra.mxu1 %v3613_v49  ;;  %v1846_v31 = vrot.slane %v4206_v14, %v4283_v7  ;;  %v1823_v49 = vxor.u32 %v1810_v48, %v4196_v8 }
 0x252   : > { %2321 = vmatprep.subr.bf16.mxu0 %v3618_v43  ;;  %2374 = vmatprep.subr.bf16.mxu1 %v3621_v12  ;;  %v1858_v43 = vrot.slane %v1842_v5, %v4193_v6  ;;  %v1824_v12 = vxor.u32 %v1814_v56, %v4196_v8 }
 0x255   : > { %2322 = vmatpush1.bf16.msra.mxu0 %v3616_v57  ;;  %2375 = vmatpush1.bf16.msra.mxu1 %v3619_v63  ;;  %v1862_v57 = vrot.slane %v1846_v31, %v4193_v6  ;;  %v1827_v63 = vxor.u32 %v1810_v48, %v4208_v15 }
 0x256   : > { %2323 = vmatprep.subr.bf16.mxu0 %v3624_v36  ;;  %2376 = vmatprep.subr.bf16.mxu1 %v3627_v17  ;;  %v1828_v36 = vxor.u32 %v1814_v56, %v4208_v15  ;;  %v1342_v17 = vld [vmem:[%s4678_s13] sm:$0xf]  ;;  %s4576_s13 = scalar_lea.sflag [#allocation4], %s602_s16 }
 0x257   : > { %v4429_v8 = vrot.slane %v1342_v17, %v4274_v58  ;;  %v4435_v15 = vrot.slane %v1342_v17, %v4283_v7 }
 0x258   : > { %v1876_v14 = vadd.s32 %v1862_v57, %v1828_v36 }
 0x259   : > { %2324 = vmatpush1.bf16.msra.mxu0 %v3622_v26  ;;  %2377 = vmatpush1.bf16.msra.mxu1 %v3625_v39  ;;  %v1871_v26 = vadd.s32 %v1858_v43, %v1823_v49  ;;  %v1872_v39 = vadd.s32 %v1862_v57, %v1824_v12 }
 0x25a   : > { %3229 = vmatprep.subr.bf16.mxu0 %v3628_v47  ;;  %3257 = vmatprep.subr.bf16.mxu1 %v3629_v38  ;;  %v1875_v47 = vadd.s32 %v1858_v43, %v1827_v63  ;;  %v1831_v38 = vxor.u32 %v1810_v48, %v4198_v9  ;;  %v1897_v63 = vand.u32 2147483648, %v4243_v61  ;;  %v1902_v61 = vand.u32 2147483648, %v4252_v13 }
 0x25c   : > { %2326 = vmatmul.mubr.bf16.vlgmr.msra.gmra.mrb[16].mxu0 %v4386_v22  ;;  %2379 = vmatmul.mubr.bf16.vlgmr.msra.gmra.mrb[16].mxu1 %v4386_v22  ;;  %v3635_v22 = vld [vmem:[#allocation10 + $0x88] sm:$0xff]  }
 0x25d   : > { %2335 = vmatprep.mubr.bf16.mxu0 %v4397_v21  ;;  %2388 = vmatprep.mubr.bf16.mxu1 %v4397_v21  ;;  %v3637_v21 = vld [vmem:[#allocation10 + $0xd0] sm:$0xff]  }
 0x25e   : > { %3230 = vmatpush3.bf16.msra.mxu0 %v3630_v18  ;;  %3258 = vmatpush3.bf16.msra.mxu1 %v3631_v34  ;;  %v4426_v18 = vrot.slane %v1342_v17, %v4189_v4  ;;  %v4432_v34 = vrot.slane %v1342_v17, %v4193_v6  ;;  %v1898_v17 = vand.u32 2147483648, %v4246_v3 }
 0x25f   : > { %3231 = vmatprep.subr.bf16.mxu0 %v3632_v28  ;;  %3259 = vmatprep.subr.bf16.mxu1 %v3633_v41  ;;  %v1832_v28 = vxor.u32 %v1814_v56, %v4198_v9  ;;  %v1887_v41 = vand.u32 2147483648, %v1871_v26  ;;  %v1894_v9 = vand.u32 2147483648, %v4241_v60 }
 0x262   : > { %3232 = vmatpush3.bf16.msra.mxu0 %v3634_v20  ;;  %3260 = vmatpush3.bf16.msra.mxu1 %v3635_v22  ;;  %v1889_v20 = vand.u32 2147483648, %v4231_v51  ;;  %v1888_v22 = vand.u32 2147483648, %v1872_v39  ;;  %v1835_v51 = vxor.u32 %v1810_v48, %v4210_v16 }
 0x263   : > { %3233 = vmatprep.subr.bf16.mxu0 %v3636_v45  ;;  %3261 = vmatprep.subr.bf16.mxu1 %v3637_v21  ;;  %v1890_v45 = vand.u32 2147483648, %v4234_v55 }
 0x264   : > { %2336 = vmatmul.mubr.bf16.gmra.mrb[20].mxu0 %v4395_v62  ;;  %2389 = vmatmul.mubr.bf16.gmra.mrb[20].mxu1 %v4395_v62  ;;  %v3639_v62 = vld [vmem:[#allocation10 + $0x90] sm:$0xff]   ;;  %v1883_v1 = vadd.s32 %v1858_v43, %v1835_v51 }
 0x266   : > { %3234 = vmatpush3.bf16.msra.mxu0 %v3638_v52  ;;  %3262 = vmatpush3.bf16.msra.mxu1 %v3639_v62  ;;  %v1891_v62 = vand.u32 2147483648, %v1875_v47 }
 0x267   : > { %3235 = vmatprep.subr.bf16.mxu0 %v3640_v37  ;;  %3263 = vmatprep.subr.bf16.mxu1 %v3641_v27  ;;  %v1893_v37 = vand.u32 2147483648, %v4239_v59  ;;  %v1892_v27 = vand.u32 2147483648, %v1876_v14  ;;  %v1836_v59 = vxor.u32 %v1814_v56, %v4210_v16 }
 0x269   : > { %v1884_v56 = vadd.s32 %v1862_v57, %v1836_v59 }
 0x26a   : > { %3236 = vmatpush3.bf16.msra.mxu0 %v3642_v19  ;;  %3264 = vmatpush3.bf16.msra.mxu1 %v3643_v23  ;;  %v1879_v19 = vadd.s32 %v1858_v43, %v1831_v38  ;;  %v1899_v43 = vand.u32 2147483648, %v1883_v1  ;;  %v1901_v38 = vand.u32 2147483648, %v4250_v11 }
 0x26b   : > { %3237 = vmatprep.subr.bf16.mxu0 %v3644_v33  ;;  %3265 = vmatprep.subr.bf16.mxu1 %v3645_v29 }
 0x26c   : > { %v1895_v49 = vand.u32 2147483648, %v1879_v19 }
 0x26e   : > { %3238 = vmatpush3.bf16.msra.mxu0 %v3646_v2  ;;  %3266 = vmatpush3.bf16.msra.mxu1 %v3647_v40 }
 0x26f   : > { %3239 = vmatprep.subr.bf16.mxu0 %v3648_v30  ;;  %3267 = vmatprep.subr.bf16.mxu1 %v3649_v24 }
 0x272   : > { %3240 = vmatpush3.bf16.msra.mxu0 %v3650_v44  ;;  %3268 = vmatpush3.bf16.msra.mxu1 %v3651_v0  ;;  %v1880_v44 = vadd.s32 %v1862_v57, %v1832_v28 }
 0x273   : > { %3241 = vmatprep.subr.bf16.mxu0 %v3652_v25  ;;  %3269 = vmatprep.subr.bf16.mxu1 %v3653_v35 }
 0x274   : > { %v1896_v36 = vand.u32 2147483648, %v1880_v44 }
 0x276   : > { %3242 = vmatpush3.bf16.msra.mxu0 %v3654_v46  ;;  %3270 = vmatpush3.bf16.msra.mxu1 %v3655_v50 }
 0x277   : > { %3243 = vmatprep.subr.bf16.mxu0 %v3656_v42  ;;  %3271 = vmatprep.subr.bf16.mxu1 %v3657_v10 }
 0x27a   : > { %3244 = vmatpush3.bf16.msra.mxu0 %v3658_v53  ;;  %3272 = vmatpush3.bf16.msra.mxu1 %v3659_v54 }
 0x2ef   : > { %v1718_v21 = vpop.f32.mrb[8].mxu0  ;;  %v1771_v52 = vpop.f32.mrb[8].mxu1 }
 0x2f0   : > { %v1719_v23 = vadd.f32 %v1718_v21, %v4426_v18  ;;  %v1772_v33 = vadd.f32 %v1771_v52, %v4429_v8  ;;  %v1720_v29 = vpop.f32.mrb[9].mxu0  ;;  %v1773_v2 = vpop.f32.mrb[9].mxu1 }
 0x2f1   : > { %v1721_v40 = vadd.f32 %v1720_v29, %v4432_v34  ;;  %v1774_v55 = vadd.f32 %v1773_v2, %v4435_v15  ;;  %v1722_v30 = vpop.f32.mrb[10].mxu0  ;;  %v1775_v24 = vpop.f32.mrb[10].mxu1 }
 0x2f2   : > { %v4448_v0 = vxor.u32 %v1887_v41, %v1719_v23  ;;  %v4450_v25 = vxor.u32 %v1889_v20, %v1772_v33  ;;  %v1723_v35 = vadd.f32 %v1722_v30, %v4426_v18  ;;  %v1776_v46 = vadd.f32 %v1775_v24, %v4429_v8  ;;  %v1724_v60 = vpop.f32.mrb[11].mxu0  ;;  %v1777_v50 = vpop.f32.mrb[11].mxu1 }
 0x2f3   : > { %v4454_v42 = vxor.u32 %v1888_v22, %v1721_v40  ;;  %v4456_v10 = vxor.u32 %v1890_v45, %v1774_v55  ;;  %v1725_v53 = vadd.f32 %v1724_v60, %v4432_v34  ;;  %v1778_v54 = vadd.f32 %v1777_v50, %v4435_v15 }
 0x2f4   : > { %v4460_v32 = vxor.u32 %v1891_v62, %v1723_v35  ;;  %v4462_v16 = vxor.u32 %v1893_v37, %v1776_v46  ;;  %v1900_v22 = vand.u32 2147483648, %v1884_v56 }
 0x2f5   : > { %v4464_v48 = vxor.u32 %v1892_v27, %v1725_v53  ;;  %v4466_v5 = vxor.u32 %v1894_v9, %v1778_v54 }
 0x2f7   : > { %v1728_v31 = vpop.f32.mrb[12].mxu0  ;;  %v1781_v12 = vpop.f32.mrb[12].mxu1 }
 0x2f8   : > { %v1729_v26 = vadd.f32 %v1728_v31, %v4426_v18  ;;  %v1782_v39 = vadd.f32 %v1781_v12, %v4429_v8  ;;  %v1730_v47 = vpop.f32.mrb[13].mxu0  ;;  %v1783_v14 = vpop.f32.mrb[13].mxu1 }
 0x2f9   : > { %v1731_v28 = vadd.f32 %v1730_v47, %v4432_v34  ;;  %v1784_v57 = vadd.f32 %v1783_v14, %v4435_v15  ;;  %v1732_v41 = vpop.f32.mrb[14].mxu0  ;;  %v1785_v20 = vpop.f32.mrb[14].mxu1 }
 0x2fa   : > { %v4476_v45 = vxor.u32 %v1895_v49, %v1729_v26  ;;  %v4478_v3 = vxor.u32 %v1897_v63, %v1782_v39  ;;  %v1733_v21 = vadd.f32 %v1732_v41, %v4426_v18  ;;  %v1786_v52 = vadd.f32 %v1785_v20, %v4429_v8  ;;  %v1734_v62 = vpop.f32.mrb[15].mxu0  ;;  %v1787_v37 = vpop.f32.mrb[15].mxu1  ;;  %v1951_v18 = vld [vmem:[%s4679_s28] sm:$0xf]  ;;  %s3808_s28 = scalar_lea.vmem %s3807_s24, 512 }
 0x2fb   : > { %v4482_v11 = vxor.u32 %v1896_v36, %v1731_v28  ;;  %v4484_v27 = vxor.u32 %v1898_v17, %v1784_v57  ;;  %v1735_v19 = vadd.f32 %v1734_v62, %v4432_v34  ;;  %v1788_v23 = vadd.f32 %v1787_v37, %v4435_v15  ;;  %p3810_p11 = scmp.lt.s32.totalorder %s3808_s28, %s3802_s0 }
 0x2fc   : > { %v4488_v33 = vxor.u32 %v1899_v43, %v1733_v21  ;;  %v4490_v13 = vxor.u32 %v1901_v38, %v1786_v52  ;;  %v4500_v8 = vrot.slane %v1951_v18, %v4189_v4  ;;  %v4503_v9 = vrot.slane %v1951_v18, %v4274_v58 }
 0x2fd   : > { %v4492_v29 = vxor.u32 %v1900_v22, %v1735_v19  ;;  %v4494_v2 = vxor.u32 %v1902_v61, %v1788_v23  ;;  %v4506_v34 = vrot.slane %v1951_v18, %v4193_v6  ;;  %v4509_v15 = vrot.slane %v1951_v18, %v4283_v7  ;;  %p3811_p5 = por %p3810_p11, %p3809_p8 }
 0x2ff   : > { %p3812_p6 = pnand %p3811_p5, %p3805_p7 }
 0x32f   : > { %v2327_v51 = vpop.f32.mrb[16].mxu0  ;;  %v2380_v40 = vpop.f32.mrb[16].mxu1 }
 0x330   : > { %v2328_v55 = vadd.f32 %v2327_v51, %v4500_v8  ;;  %v2381_v30 = vadd.f32 %v2380_v40, %v4503_v9  ;;  %v2329_v24 = vpop.f32.mrb[17].mxu0  ;;  %v2382_v44 = vpop.f32.mrb[17].mxu1 }
 0x331   : > { %v2330_v4 = vadd.f32 %v2329_v24, %v4506_v34  ;;  %v2383_v59 = vadd.f32 %v2382_v44, %v4509_v15  ;;  %v2331_v58 = vpop.f32.mrb[18].mxu0  ;;  %v2384_v35 = vpop.f32.mrb[18].mxu1 }
 0x332   : > { %v2399_v6 = vadd.f32 %v2328_v55, %v4448_v0  ;;  %v2401_v46 = vadd.f32 %v2381_v30, %v4450_v25  ;;  %v2332_v7 = vadd.f32 %v2331_v58, %v4500_v8  ;;  %v2385_v60 = vadd.f32 %v2384_v35, %v4503_v9  ;;  %v2333_v50 = vpop.f32.mrb[19].mxu0  ;;  %v2386_v53 = vpop.f32.mrb[19].mxu1 }
 0x333   : > { %v2400_v54 = vadd.f32 %v2330_v4, %v4454_v42  ;;  %v2402_v1 = vadd.f32 %v2383_v59, %v4456_v10  ;;  %v2334_v56 = vadd.f32 %v2333_v50, %v4506_v34  ;;  %v2387_v31 = vadd.f32 %v2386_v53, %v4509_v15 }
 0x334   : > { %vm2415_vm8 = vcmp.gt.f32.partialorder %v2399_v6, 0.0  ;;  %v2431_v49 = vmul.f32 0.01, %v2399_v6  ;;  %vm2417_vm9 = vcmp.gt.f32.partialorder %v2401_v46, 0.0  ;;  %v2433_v0 = vmul.f32 0.01, %v2401_v46 }
 0x335   : > { %vm2416_vm10 = vcmp.gt.f32.partialorder %v2400_v54, 0.0  ;;  %v2432_v25 = vmul.f32 0.01, %v2400_v54  ;;  %vm2418_vm11 = vcmp.gt.f32.partialorder %v2402_v1, 0.0  ;;  %v2434_v12 = vmul.f32 0.01, %v2402_v1 }
 0x336   : > { %v4523_v63 = vsel %vm2415_vm8, %v2399_v6, %v2431_v49  ;;  %v4525_v36 = vsel %vm2417_vm9, %v2401_v46, %v2433_v0  ;;  %v2403_v42 = vadd.f32 %v2332_v7, %v4460_v32  ;;  %v2405_v10 = vadd.f32 %v2385_v60, %v4462_v16 }
 0x337   : > { %v2404_v17 = vadd.f32 %v2334_v56, %v4464_v48  ;;  %v2406_v26 = vadd.f32 %v2387_v31, %v4466_v5  ;;  %v2337_v39 = vpop.f32.mrb[20].mxu0  ;;  %v2390_v47 = vpop.f32.mrb[20].mxu1  ;;  %v4531_v14 = vsel %vm2416_vm10, %v2400_v54, %v2432_v25  ;;  %v4533_v43 = vsel %vm2418_vm11, %v2402_v1, %v2434_v12 }
 0x338   : > { %vm2419_vm12 = vcmp.gt.f32.partialorder %v2403_v42, 0.0  ;;  %v2435_v38 = vmul.f32 0.01, %v2403_v42  ;;  %vm2421_vm13 = vcmp.gt.f32.partialorder %v2405_v10, 0.0  ;;  %v2437_v28 = vmul.f32 0.01, %v2405_v10 }
 0x339   : > { %vm2420_vm14 = vcmp.gt.f32.partialorder %v2404_v17, 0.0  ;;  %v2436_v57 = vmul.f32 0.01, %v2404_v17  ;;  %vm2422_vm15 = vcmp.gt.f32.partialorder %v2406_v26, 0.0  ;;  %v2438_v32 = vmul.f32 0.01, %v2406_v26 }
 0x33a   : > { %v2451_v41 = vsel %vm2419_vm12, %v2403_v42, %v2435_v38  ;;  %v2453_v16 = vsel %vm2421_vm13, %v2405_v10, %v2437_v28  ;;  %v2338_v48 = vadd.f32 %v2337_v39, %v4500_v8  ;;  %v2391_v5 = vadd.f32 %v2390_v47, %v4503_v9  ;;  %v2339_v20 = vpop.f32.mrb[21].mxu0  ;;  %v2392_v22 = vpop.f32.mrb[21].mxu1  ;;  %v3171_v42 = vld [vmem:[%s4681_s29] ss:$0 sm:$0xff] }
 0x33b   : > { %v2463_v61 = vpack.c.bf16 %v2451_v41, %v4523_v63  ;;  %v2465_v21 = vpack.c.bf16 %v2453_v16, %v4525_v36  ;;  %v2340_v52 = vadd.f32 %v2339_v20, %v4506_v34  ;;  %v2393_v62 = vadd.f32 %v2392_v22, %v4509_v15  ;;  %v2341_v37 = vpop.f32.mrb[22].mxu0  ;;  %v2394_v19 = vpop.f32.mrb[22].mxu1 }
 0x33c   : > { %v2407_v23 = vadd.f32 %v2338_v48, %v4476_v45  ;;  %v2409_v18 = vadd.f32 %v2391_v5, %v4478_v3  ;;  %v2342_v51 = vadd.f32 %v2341_v37, %v4500_v8  ;;  %v2395_v40 = vadd.f32 %v2394_v19, %v4503_v9  ;;  %v2343_v55 = vpop.f32.mrb[23].mxu0  ;;  %v2396_v30 = vpop.f32.mrb[23].mxu1 }
 0x33d   : > { %v2408_v24 = vadd.f32 %v2340_v52, %v4482_v11  ;;  %v2410_v44 = vadd.f32 %v2393_v62, %v4484_v27  ;;  %v2344_v4 = vadd.f32 %v2343_v55, %v4506_v34  ;;  %v2397_v59 = vadd.f32 %v2396_v30, %v4509_v15 }
 0x33e   : > { %vm2423_vm0 = vcmp.gt.f32.partialorder %v2407_v23, 0.0  ;;  %v2439_v58 = vmul.f32 0.01, %v2407_v23  ;;  %vm2425_vm1 = vcmp.gt.f32.partialorder %v2409_v18, 0.0  ;;  %v2441_v45 = vmul.f32 0.01, %v2409_v18 }
 0x33f   : > { %vm2424_vm2 = vcmp.gt.f32.partialorder %v2408_v24, 0.0  ;;  %v2440_v3 = vmul.f32 0.01, %v2408_v24  ;;  %vm2426_vm3 = vcmp.gt.f32.partialorder %v2410_v44, 0.0  ;;  %v2442_v8 = vmul.f32 0.01, %v2410_v44 }
 0x340   : > { %v2411_v9 = vadd.f32 %v2342_v51, %v4488_v33  ;;  %v2413_v35 = vadd.f32 %v2395_v40, %v4490_v13  ;;  %v2412_v11 = vadd.f32 %v2344_v4, %v4492_v29  ;;  %v2414_v27 = vadd.f32 %v2397_v59, %v4494_v2 }
 0x341   : > { %v2452_v34 = vsel %vm2420_vm14, %v2404_v17, %v2436_v57  ;;  %v2454_v15 = vsel %vm2422_vm15, %v2406_v26, %v2438_v32  ;;  %v2456_v6 = vsel %vm2424_vm2, %v2408_v24, %v2440_v3  ;;  %v2458_v46 = vsel %vm2426_vm3, %v2410_v44, %v2442_v8 }
 0x342   : > { %vm2427_vm4 = vcmp.gt.f32.partialorder %v2411_v9, 0.0  ;;  %v2443_v7 = vmul.f32 0.01, %v2411_v9  ;;  %vm2429_vm5 = vcmp.gt.f32.partialorder %v2413_v35, 0.0  ;;  %v2445_v60 = vmul.f32 0.01, %v2413_v35 }
 0x343   : > { %vm2428_vm6 = vcmp.gt.f32.partialorder %v2412_v11, 0.0  ;;  %v2444_v50 = vmul.f32 0.01, %v2412_v11  ;;  %vm2430_vm7 = vcmp.gt.f32.partialorder %v2414_v27, 0.0  ;;  %v2446_v33 = vmul.f32 0.01, %v2414_v27 }
 0x344   : > { %v2464_v13 = vpack.c.bf16 %v2452_v34, %v4531_v14  ;;  %v2466_v29 = vpack.c.bf16 %v2454_v15, %v4533_v43  ;;  %v2455_v2 = vsel %vm2423_vm0, %v2407_v23, %v2439_v58  ;;  %v2459_v53 = vsel %vm2427_vm4, %v2411_v9, %v2443_v7 }
 0x345   : > { %v2460_v54 = vsel %vm2428_vm6, %v2412_v11, %v2444_v50  ;;  %v2462_v1 = vsel %vm2430_vm7, %v2414_v27, %v2446_v33  ;;  %v2467_v56 = vpack.c.bf16 %v2459_v53, %v2455_v2  ;;  %v2457_v31 = vsel %vm2425_vm1, %v2409_v18, %v2441_v45 }
 0x346   : > { %2766 = vmatprep.mubr.bf16.mxu0 %v2464_v13  ;;  %2815 = vmatprep.mubr.bf16.mxu1 %v2466_v29  ;;  %v2468_v49 = vpack.c.bf16 %v2460_v54, %v2456_v6  ;;  %v2470_v0 = vpack.c.bf16 %v2462_v1, %v2458_v46  ;;  %v2461_v25 = vsel %vm2429_vm5, %v2413_v35, %v2445_v60 }
 0x347   : > { %2767 = vmatmul.mubr.bf16.vlgmr.msra.gmra.mrb[24].mxu0 %v2463_v61  ;;  %2816 = vmatmul.mubr.bf16.vlgmr.msra.gmra.mrb[24].mxu1 %v2465_v21  ;;  %v2469_v12 = vpack.c.bf16 %v2461_v25, %v2457_v31 }
 0x348   : > { %2774 = vmatprep.mubr.bf16.mxu0 %v2468_v49  ;;  %2823 = vmatprep.mubr.bf16.mxu1 %v2470_v0 }
 0x34f   : > { %2775 = vmatmul.mubr.bf16.gmra.mrb[28].mxu0 %v2467_v56  ;;  %2824 = vmatmul.mubr.bf16.gmra.mrb[28].mxu1 %v2469_v12 }
 0x41a   : > { %v3245_v63 = vpop.f32.mrb[24].mxu0  ;;  %v3273_v36 = vpop.f32.mrb[24].mxu1 }
 0x41b   : > { %v3246_v10 = vpop.f32.mrb[25].mxu0  ;;  %v3274_v17 = vpop.f32.mrb[25].mxu1 }
 0x41c   : > { %v3247_v26 = vadd.f32 %v3246_v10, %v3245_v63  ;;  %v3275_v39 = vadd.f32 %v3274_v17, %v3273_v36  ;;  %v3248_v47 = vpop.f32.mrb[26].mxu0  ;;  %v3276_v14 = vpop.f32.mrb[26].mxu1 }
 0x41d   : > { %v3249_v43 = vpop.f32.mrb[27].mxu0  ;;  %v3277_v38 = vpop.f32.mrb[27].mxu1 }
 0x41e   : > { %v2769_v28 = vadd.f32 %v3247_v26, %v3171_v42  ;;  %v3250_v57 = vadd.f32 %v3249_v43, %v3248_v47  ;;  %v3278_v32 = vadd.f32 %v3277_v38, %v3276_v14 }
 0x420   : > { %v2818_v41 = vadd.f32 %v3275_v39, %v2769_v28  ;;  %v2772_v16 = vadd.f32 %v3250_v57, %v3171_v42 }
 0x422   : > { %v2821_v48 = vadd.f32 %v3278_v32, %v2772_v16  ;;  %v3251_v5 = vpop.f32.mrb[28].mxu0  ;;  %v3279_v20 = vpop.f32.mrb[28].mxu1 }
 0x423   : > { %v3252_v22 = vpop.f32.mrb[29].mxu0  ;;  %v3280_v61 = vpop.f32.mrb[29].mxu1 }
 0x424   : > { %v3221_v21 = vpack.c.bf16 %v2821_v48, %v2818_v41  ;;  %v3253_v52 = vadd.f32 %v3252_v22, %v3251_v5  ;;  %v3281_v62 = vadd.f32 %v3280_v61, %v3279_v20  ;;  %v3254_v37 = vpop.f32.mrb[30].mxu0  ;;  %v3282_v19 = vpop.f32.mrb[30].mxu1 }
 0x425   : > { %v3255_v23 = vpop.f32.mrb[31].mxu0  ;;  %v3283_v18 = vpop.f32.mrb[31].mxu1 }
 0x426   : > { %3222 = vst [vmem:[%s604_s30] sm:$0xff] %v3221_v21   ;;  %v2777_v51 = vadd.f32 %v3253_v52, %v3171_v42  ;;  %v3256_v40 = vadd.f32 %v3255_v23, %v3254_v37  ;;  %v3284_v55 = vadd.f32 %v3283_v18, %v3282_v19 }
 0x428   : > { %v2826_v30 = vadd.f32 %v3281_v62, %v2777_v51  ;;  %v2780_v24 = vadd.f32 %v3256_v40, %v3171_v42 }
 0x42a   : > { %v2829_v44 = vadd.f32 %v3284_v55, %v2780_v24 }
 0x42c   : > { %v3226_v4 = vpack.c.bf16 %v2829_v44, %v2826_v30 }
 0x42e   : > { %3228 = vst [vmem:[%s604_s30 + $0x8] sm:$0xff] %v3226_v4  }
 0x42f   : > { %3815 = shalt.err (!%p3812_p6)
}
 0x430   : > { %s3816_s23 = scalar_lea.hbm %s4572_s22, 256  ;;  %s3820_s29 = scalar_lea.hbm %s4683_s15, 512 }
 0x431   : > { %p3817_p0 = scmp.ne.s32.totalorder %s4572_s22, %s3816_s23  ;;  %p3821_p13 = scmp.lt.u32.totalorder %s4572_s22, %s4683_s15 }
 0x432   : > { %p3822_p12 = scmp.lt.u32.totalorder %s3820_s29, %s3816_s23  ;;  %p3824_p2 = scmp.lt.u32.totalorder %s3816_s23, %s4572_s22 }
 0x433   : > { %p3818_p9 = pnand %p3817_p0, %p4684_p3 }
 0x434   : > { %p3823_p1 = por %p3822_p12, %p3821_p13 }
 0x435   : > { %p3819_p10 = pneg %p3818_p9 }
 0x436   : > { %p3825_p4 = por %p3824_p2, %p3823_p1 }
 0x438   : > { %p3826_p7 = pnand %p3825_p4, %p3819_p10 }
 0x43a   : > { %3829 = shalt.err (!%p3826_p7)
}
 0x43b   : > { %s3891_s30 = smov 64   ;;  %s3892_s26 = smov 4  }
 0x43c   : > { %3305 = dma.vmem_to_hbm [thread:$0]  (%p4684_p3), %s4567_s18, 256, %s4572_s22, %s4576_s13, %s3891_s30, %s3891_s30, %s3892_s26  }
 0x43d PF: > { %s4685_s19 = sld [smem:[#allocation19_spill]]  ;;  %s4686_s27 = sld [smem:[#allocation16_spill]] }
 0x43e   : > { %s4687_s0 = sld [smem:[#allocation23_spill]] }
 0x443   : > { %p3337_p8 = scmp.ge.s32.totalorder %s4685_s19, 2  ;;  %s2881_s25 = sand.u32 1, %s4686_s27  }
 0x444   : > { %p4688_p11 = scmp.ne.s32.totalorder %s4687_s0, 0  ;;  %s2882_s24 = scalar_lea.sflag [#allocation4], %s2881_s25 }
 0x446   : > { %p3324_p5 = pnand %p3337_p8, %p4688_p11 }
 0x448   : > { %3859 = dma.done.wait (!%p3324_p5), %s2882_s24, 256  }
 0x449   : > { %3861 = vsyncadd (!%p3324_p5), %s2882_s24, 4294967040  ;;  %s4689_s24 = sld [smem:[#allocation20_spill]]  ;;  %s4690_s21 = sld [smem:[#allocation17_spill]] }
 0x44a   : > { %s4691_s22 = sld [smem:[#allocation18_spill]]  ;;  %s4692_s23 = sld [smem:[#allocation21_spill]] }
 0x44f   : > { %p29_p6 = scmp.ge.s32.totalorder %s4689_s24, 4  }
 0x451   :  { %31 = sbr.rel (!%p29_p6) target bundleno = 12 (0xc), region = 143 }
 0x458   :  { %2887 = vsyncpa [#allocation3], 1 }
 0x459   :  { %2889 = vsyncpa [#allocation3 + $0x1], 1 }
 0x45a   :  { %2890 = vsyncpa [#allocation6], 1 }
 0x45b   :  { %2891 = vsyncpa [#allocation9], 1 }
 0x45c   :  { %2892 = vsyncpa [#allocation4], 1 }
 0x45d   :  { %2894 = vsyncpa [#allocation4 + $0x1], 1 }

</bundles_post_ra>
